<compile_context>
chip_gen: v7x
topology: tpu7x:2x2x1
jax: 0.10.0
libtpu: 0.0.40
codegen_flags: <defaults>
</compile_context>

<pallas_src>
import jax
import jax.numpy as jnp
from jax.experimental import pallas as pl
from jax.experimental.pallas import tpu as pltpu


def _min_grid_steps():
    """>=2 grid steps only on chips with multiple TensorCores per chip."""
    try:
        kind = jax.devices()[0].device_kind.lower()
    except Exception:
        return 2
    single_tc = any(t in kind for t in ("v5 lite", "v5e", "v5litepod", "v6 lite", "v6e"))
    return 1 if single_tc else 2


def _pick_block_batch(n, h, max_rows=256, min_grid_steps=2):
    """Largest images-per-step whose row count (nb*h) is a multiple of 8,
    preferring >= min_grid_steps grid steps (to feed multiple TensorCores)."""
    best_any = None
    for nb in range(n, 0, -1):
        if n % nb != 0 or (nb * h) % 8 != 0 or nb * h > max_rows:
            continue
        if best_any is None:
            best_any = nb
        if n // nb >= min_grid_steps:
            return nb
    return best_any if best_any is not None else n


def bottleneck_forward(x_nchw, params, *, block_batch=None):
    """x_nchw: (N, Cin, H, W) float32. Returns (N, Cout, H, W)."""
    (w1, s1, b1, w2, s2, b2, w3, s3, b3) = params
    x = jnp.transpose(x_nchw, (0, 2, 3, 1)).astype(jnp.float32)   # -> NHWC
    N, H, W, Cin = x.shape
    Cmid = w1.shape[1]
    Cout = w3.shape[1]
    assert Cin == Cout, "identity residual requires inplanes == planes*4"

    Nb = (block_batch if block_batch is not None
          else _pick_block_batch(N, H, min_grid_steps=_min_grid_steps()))
    assert N % Nb == 0
    R = Nb * H                       # rows per grid step
    assert R % 8 == 0, "Nb*H must be a multiple of 8 for the TPU block tiling"
    WCin, WCmid, WCout = W * Cin, W * Cmid, W * Cout

    # --- slab-layout parameters (built once, wrapper side) ------------------
    f32, bf16 = jnp.float32, jnp.bfloat16
    # BN scales folded into the conv weights (exact: the pixel/row shifts
    # preserve the per-pixel channel index, so per-channel scaling commutes).
    w1f = (jnp.kron(jnp.eye(W, dtype=f32), w1) * jnp.tile(s1, (1, W))).astype(bf16)
    w3f = (jnp.kron(jnp.eye(W, dtype=f32), w3) * jnp.tile(s3, (1, W))).astype(bf16)
    w2f = jnp.tile(w2 * s2, (1, W)).astype(f32)          # (9, W*Cmid) depthwise taps
    b1s = jnp.tile(b1, (1, W)).astype(f32)
    b2s = jnp.tile(b2, (1, W)).astype(f32)
    b3s = jnp.tile(b3, (1, W)).astype(f32)

    x_slab = x.reshape(N * H, WCin)                       # lane-dense slab

    # Static (positive) rotation amounts for the depthwise taps.
    row_shift = {-1: 1 % R, 1: (R - 1) % R}               # out[r] = in[r - dy]
    col_shift = {-1: Cmid % WCmid, 1: (WCmid - Cmid) % WCmid}

    def kernel(x_ref, w1_ref, b1_ref, w2_ref, b2_ref, w3_ref, b3_ref, o_ref):
        xs = x_ref[...]                                   # (R, W*Cin) f32

        # ---- conv1 (1x1, BN scale folded) + bias + relu : bf16 MXU matmul ----
        h1 = jnp.dot(xs.astype(jnp.bfloat16), w1_ref[...],
                     preferred_element_type=jnp.float32)
        h1 = jnp.maximum(h1 + b1_ref[...], 0.0)           # (R, W*Cmid)

        # Border masks (zero the rows/pixels that wrapped around in the roll).
        ri = jax.lax.broadcasted_iota(jnp.int32, (R, WCmid), 0)
        ci = jax.lax.broadcasted_iota(jnp.int32, (R, WCmid), 1)
        rmod = (ri & (H - 1)) if (H & (H - 1)) == 0 else (ri % H)
        row_ok = {-1: rmod != 0, 1: rmod != (H - 1)}       # valid source row exists
        col_ok = {-1: ci >= Cmid, 1: ci < (WCmid - Cmid)}  # valid source pixel exists

        # ---- conv2: depthwise 3x3 (stride 1, pad 1) + bias + relu ----
        # Shifts are XLU rotations; ky-shifted source built just-in-time.
        w2v = w2_ref[...]                                  # (9, W*Cmid)
        acc = None
        for ky in range(3):
            dy = ky - 1
            if dy == 0:
                src = h1
            else:
                src = jnp.where(row_ok[dy],
                                pltpu.roll(h1, shift=row_shift[dy], axis=0), 0.0)
            for kx in range(3):
                dx = kx - 1
                if dx == 0:
                    t = src
                else:
                    t = jnp.where(col_ok[dx],
                                  pltpu.roll(src, shift=col_shift[dx], axis=1), 0.0)
                term = t * w2v[3 * ky + kx]
                acc = term if acc is None else acc + term
        h2 = jnp.maximum(acc + b2_ref[...], 0.0)           # (R, W*Cmid)

        # ---- conv3 (1x1, BN scale folded) + bias, identity residual, relu ----
        h3 = jnp.dot(h2.astype(jnp.bfloat16), w3_ref[...],
                     preferred_element_type=jnp.float32)
        o_ref[...] = jnp.maximum(h3 + b3_ref[...] + xs, 0.0).astype(o_ref.dtype)

    out_slab = pl.pallas_call(
        kernel,
        out_shape=jax.ShapeDtypeStruct((N * H, WCout), jnp.float32),
        grid_spec=pltpu.PrefetchScalarGridSpec(
            num_scalar_prefetch=0,
            grid=(N // Nb,),
            in_specs=[
                pl.BlockSpec((R, WCin), lambda n: (n, 0)),        # x slab
                pl.BlockSpec((WCin, WCmid), lambda n: (0, 0)),    # conv1 block-diag (bf16)
                pl.BlockSpec((1, WCmid), lambda n: (0, 0)),       # bn1 bias
                pl.BlockSpec((9, WCmid), lambda n: (0, 0)),       # depthwise taps (scaled)
                pl.BlockSpec((1, WCmid), lambda n: (0, 0)),       # bn2 bias
                pl.BlockSpec((WCmid, WCout), lambda n: (0, 0)),   # conv3 block-diag (bf16)
                pl.BlockSpec((1, WCout), lambda n: (0, 0)),       # bn3 bias
            ],
            out_specs=pl.BlockSpec((R, WCout), lambda n: (n, 0)),
        ),
        compiler_params=pltpu.CompilerParams(dimension_semantics=("parallel",)),
    )(x_slab, w1f, b1s, w2f, b2s, w3f, b3s)

    out = out_slab.reshape(N, H, W, Cout)
    # TODO(synk): if this block feeds a larger network, keep activations in the
    # NHWC/slab layout between bottlenecks instead of transposing every call.
    return jnp.transpose(out, (0, 3, 1, 2))               # -> NCHW


def _fold_bn(gamma, beta, mean, var, eps=1e-5):
    scale = gamma / jnp.sqrt(var + eps)
    bias = beta - mean * scale
    return scale.reshape(1, -1), bias.reshape(1, -1)


def _make_params(key, cin, cmid, cout):
    ks = jax.random.split(key, 15)
    w1 = jax.random.normal(ks[0], (cin, cmid), jnp.float32) * 0.1   # conv1: (Cmid,Cin,1,1).T
    w2 = jax.random.normal(ks[1], (9, cmid), jnp.float32) * 0.1     # conv2 depthwise: (Cmid,1,3,3) -> (9,Cmid)
    w3 = jax.random.normal(ks[2], (cmid, cout), jnp.float32) * 0.1  # conv3: (Cout,Cmid,1,1).T
    def bn(i, c):
        g = 1.0 + 0.1 * jax.random.normal(ks[3 + 4 * i], (c,), jnp.float32)
        b = 0.1 * jax.random.normal(ks[4 + 4 * i], (c,), jnp.float32)
        m = 0.1 * jax.random.normal(ks[5 + 4 * i], (c,), jnp.float32)
        v = jnp.abs(1.0 + 0.1 * jax.random.normal(ks[6 + 4 * i], (c,), jnp.float32))
        return _fold_bn(g, b, m, v)
    s1, b1 = bn(0, cmid)
    s2, b2 = bn(1, cmid)
    s3, b3 = bn(2, cout)
    return (w1, s1, b1, w2, s2, b2, w3, s3, b3)


def _reference(x_nchw, params):
    """Pure-JAX (NHWC, f32) reference of the same forward pass."""
    (w1, s1, b1, w2, s2, b2, w3, s3, b3) = params
    x = jnp.transpose(x_nchw, (0, 2, 3, 1)).astype(jnp.float32)
    N, H, W, _ = x.shape
    h1 = jnp.maximum(jnp.einsum('nhwc,cd->nhwd', x, w1) * s1 + b1, 0.0)
    padded = jnp.pad(h1, ((0, 0), (1, 1), (1, 1), (0, 0)))
    acc = jnp.zeros_like(h1)
    for ky in range(3):
        for kx in range(3):
            acc = acc + padded[:, ky:ky + H, kx:kx + W, :] * w2[3 * ky + kx]
    h2 = jnp.maximum(acc * s2 + b2, 0.0)
    h3 = jnp.einsum('nhwc,cd->nhwd', h2, w3) * s3 + b3
    out = jnp.maximum(h3 + x, 0.0)
    return jnp.transpose(out, (0, 3, 1, 2))


if __name__ == "__main__":
    # Module hyperparameters (see header): inplanes=64, planes=16,
    # cardinality=1, baseWidth=16 -> Cin=64, Cmid=64, Cout=64.
    N, Cin, H, W = 4, 64, 8, 8
    Cmid, Cout = 64, 64

    key = jax.random.PRNGKey(0)
    kx_, kp_ = jax.random.split(key)
    x = jax.random.normal(kx_, (N, Cin, H, W), jnp.float32)
    params = _make_params(kp_, Cin, Cmid, Cout)

    out = jax.block_until_ready(bottleneck_forward(x, params))
    ref = jax.block_until_ready(_reference(x, params))

    assert out.shape == (N, Cout, H, W)
    max_err = float(jnp.max(jnp.abs(out - ref)))
    # The 1x1 convs run with bf16 MXU operands (f32 accumulation) against an
    # f32 reference; observed error is a few 1e-3, tolerance leaves headroom.
    assert jnp.allclose(out, ref, rtol=2e-2, atol=2e-2), (
        f"mismatch vs JAX reference (max abs err {max_err:.3e})")

    print("KERNEL_OK")
</pallas_src>

<mosaic_0001>
module attributes {stable_mosaic.version = 11 : i64} {
  func.func @kernel(%arg0: i32, %arg1: memref<16x512xf32, #tpu.memory_space<vmem>>, %arg2: memref<512x512xbf16, #tpu.memory_space<vmem>>, %arg3: memref<1x512xf32, #tpu.memory_space<vmem>>, %arg4: memref<9x512xf32, #tpu.memory_space<vmem>>, %arg5: memref<1x512xf32, #tpu.memory_space<vmem>>, %arg6: memref<512x512xbf16, #tpu.memory_space<vmem>>, %arg7: memref<1x512xf32, #tpu.memory_space<vmem>>, %arg8: memref<16x512xf32, #tpu.memory_space<vmem>>) attributes {dimension_semantics = [#tpu.dimension_semantics<parallel>], iteration_bounds = array<i64: 2>, scalar_prefetch = 0 : i64, scratch_operands = 0 : i64, tpu.core_type = #tpu.core_type<tc>, window_params = [{transform_indices = @transform_0, window_bounds = array<i64: 16, 512>}, {pipeline_mode = #tpu.pipeline_mode<synchronous>, transform_indices = @transform_1, window_bounds = array<i64: 512, 512>}, {pipeline_mode = #tpu.pipeline_mode<synchronous>, transform_indices = @transform_2, window_bounds = array<i64: 1, 512>}, {pipeline_mode = #tpu.pipeline_mode<synchronous>, transform_indices = @transform_3, window_bounds = array<i64: 9, 512>}, {pipeline_mode = #tpu.pipeline_mode<synchronous>, transform_indices = @transform_4, window_bounds = array<i64: 1, 512>}, {pipeline_mode = #tpu.pipeline_mode<synchronous>, transform_indices = @transform_5, window_bounds = array<i64: 512, 512>}, {pipeline_mode = #tpu.pipeline_mode<synchronous>, transform_indices = @transform_6, window_bounds = array<i64: 1, 512>}, {transform_indices = @transform_7, window_bounds = array<i64: 16, 512>}]} {
    %c0 = arith.constant 0 : index
    %c0_0 = arith.constant 0 : index
    %0 = vector.load %arg1[%c0, %c0_0] : memref<16x512xf32, #tpu.memory_space<vmem>>, vector<16x512xf32>
    %1 = arith.truncf %0 : vector<16x512xf32> to vector<16x512xbf16>
    %c0_1 = arith.constant 0 : index
    %c0_2 = arith.constant 0 : index
    %2 = vector.load %arg2[%c0_1, %c0_2] : memref<512x512xbf16, #tpu.memory_space<vmem>>, vector<512x512xbf16>
    %cst = arith.constant dense<0.000000e+00> : vector<16x512xf32>
    %3 = tpu.matmul %1, %2, %cst {dimension_numbers = #tpu.dot_dimension_numbers<[1], [0], [0], [1], [0, 0, 1, 1], [], []>} : vector<16x512xbf16>, vector<512x512xbf16>, vector<16x512xf32> -> vector<16x512xf32>
    %c0_3 = arith.constant 0 : index
    %c0_4 = arith.constant 0 : index
    %4 = vector.load %arg3[%c0_3, %c0_4] : memref<1x512xf32, #tpu.memory_space<vmem>>, vector<1x512xf32>
    %5 = vector.broadcast %4 : vector<1x512xf32> to vector<16x512xf32>
    %6 = arith.addf %3, %5 : vector<16x512xf32>
    %cst_5 = arith.constant 0.000000e+00 : f32
    %7 = vector.broadcast %cst_5 : f32 to vector<16x512xf32>
    %8 = arith.maximumf %6, %7 : vector<16x512xf32>
    %9 = tpu.iota {dimensions = array<i32: 0>} : vector<16x512xi32>
    %10 = tpu.iota {dimensions = array<i32: 1>} : vector<16x512xi32>
    %c7_i32 = arith.constant 7 : i32
    %11 = vector.broadcast %c7_i32 : i32 to vector<16x512xi32>
    %12 = arith.andi %9, %11 : vector<16x512xi32>
    %c0_i32 = arith.constant 0 : i32
    %13 = vector.broadcast %c0_i32 : i32 to vector<16x512xi32>
    %14 = arith.cmpi ne, %12, %13 : vector<16x512xi32>
    %c7_i32_6 = arith.constant 7 : i32
    %15 = vector.broadcast %c7_i32_6 : i32 to vector<16x512xi32>
    %16 = arith.cmpi ne, %12, %15 : vector<16x512xi32>
    %c64_i32 = arith.constant 64 : i32
    %17 = vector.broadcast %c64_i32 : i32 to vector<16x512xi32>
    %18 = arith.cmpi sge, %10, %17 : vector<16x512xi32>
    %c448_i32 = arith.constant 448 : i32
    %19 = vector.broadcast %c448_i32 : i32 to vector<16x512xi32>
    %20 = arith.cmpi slt, %10, %19 : vector<16x512xi32>
    %c0_7 = arith.constant 0 : index
    %c0_8 = arith.constant 0 : index
    %21 = vector.load %arg4[%c0_7, %c0_8] : memref<9x512xf32, #tpu.memory_space<vmem>>, vector<9x512xf32>
    %c1_i32 = arith.constant 1 : i32
    %22 = tpu.dynamic_rotate %8 by %c1_i32 dim 0 : vector<16x512xf32>, i32 -> vector<16x512xf32>
    %cst_9 = arith.constant 0.000000e+00 : f32
    %23 = vector.broadcast %cst_9 : f32 to vector<16x512xf32>
    %24 = arith.select %14, %22, %23 : vector<16x512xi1>, vector<16x512xf32>
    %c64_i32_10 = arith.constant 64 : i32
    %25 = tpu.dynamic_rotate %24 by %c64_i32_10 dim 1 : vector<16x512xf32>, i32 -> vector<16x512xf32>
    %cst_11 = arith.constant 0.000000e+00 : f32
    %26 = vector.broadcast %cst_11 : f32 to vector<16x512xf32>
    %27 = arith.select %18, %25, %26 : vector<16x512xi1>, vector<16x512xf32>
    %28 = vector.extract_strided_slice %21 {offsets = [0, 0], sizes = [1, 512], strides = [1, 1]} : vector<9x512xf32> to vector<1x512xf32>
    %29 = vector.shape_cast %28 : vector<1x512xf32> to vector<512xf32>
    %30 = vector.shape_cast %29 : vector<512xf32> to vector<1x512xf32>
    %31 = vector.broadcast %30 : vector<1x512xf32> to vector<16x512xf32>
    %32 = arith.mulf %27, %31 : vector<16x512xf32>
    %33 = vector.extract_strided_slice %21 {offsets = [1, 0], sizes = [1, 512], strides = [1, 1]} : vector<9x512xf32> to vector<1x512xf32>
    %34 = vector.shape_cast %33 : vector<1x512xf32> to vector<512xf32>
    %35 = vector.shape_cast %34 : vector<512xf32> to vector<1x512xf32>
    %36 = vector.broadcast %35 : vector<1x512xf32> to vector<16x512xf32>
    %37 = arith.mulf %24, %36 : vector<16x512xf32>
    %38 = arith.addf %32, %37 : vector<16x512xf32>
    %c448_i32_12 = arith.constant 448 : i32
    %39 = tpu.dynamic_rotate %24 by %c448_i32_12 dim 1 : vector<16x512xf32>, i32 -> vector<16x512xf32>
    %cst_13 = arith.constant 0.000000e+00 : f32
    %40 = vector.broadcast %cst_13 : f32 to vector<16x512xf32>
    %41 = arith.select %20, %39, %40 : vector<16x512xi1>, vector<16x512xf32>
    %42 = vector.extract_strided_slice %21 {offsets = [2, 0], sizes = [1, 512], strides = [1, 1]} : vector<9x512xf32> to vector<1x512xf32>
    %43 = vector.shape_cast %42 : vector<1x512xf32> to vector<512xf32>
    %44 = vector.shape_cast %43 : vector<512xf32> to vector<1x512xf32>
    %45 = vector.broadcast %44 : vector<1x512xf32> to vector<16x512xf32>
    %46 = arith.mulf %41, %45 : vector<16x512xf32>
    %47 = arith.addf %38, %46 : vector<16x512xf32>
    %c64_i32_14 = arith.constant 64 : i32
    %48 = tpu.dynamic_rotate %8 by %c64_i32_14 dim 1 : vector<16x512xf32>, i32 -> vector<16x512xf32>
    %cst_15 = arith.constant 0.000000e+00 : f32
    %49 = vector.broadcast %cst_15 : f32 to vector<16x512xf32>
    %50 = arith.select %18, %48, %49 : vector<16x512xi1>, vector<16x512xf32>
    %51 = vector.extract_strided_slice %21 {offsets = [3, 0], sizes = [1, 512], strides = [1, 1]} : vector<9x512xf32> to vector<1x512xf32>
    %52 = vector.shape_cast %51 : vector<1x512xf32> to vector<512xf32>
    %53 = vector.shape_cast %52 : vector<512xf32> to vector<1x512xf32>
    %54 = vector.broadcast %53 : vector<1x512xf32> to vector<16x512xf32>
    %55 = arith.mulf %50, %54 : vector<16x512xf32>
    %56 = arith.addf %47, %55 : vector<16x512xf32>
    %57 = vector.extract_strided_slice %21 {offsets = [4, 0], sizes = [1, 512], strides = [1, 1]} : vector<9x512xf32> to vector<1x512xf32>
    %58 = vector.shape_cast %57 : vector<1x512xf32> to vector<512xf32>
    %59 = vector.shape_cast %58 : vector<512xf32> to vector<1x512xf32>
    %60 = vector.broadcast %59 : vector<1x512xf32> to vector<16x512xf32>
    %61 = arith.mulf %8, %60 : vector<16x512xf32>
    %62 = arith.addf %56, %61 : vector<16x512xf32>
    %c448_i32_16 = arith.constant 448 : i32
    %63 = tpu.dynamic_rotate %8 by %c448_i32_16 dim 1 : vector<16x512xf32>, i32 -> vector<16x512xf32>
    %cst_17 = arith.constant 0.000000e+00 : f32
    %64 = vector.broadcast %cst_17 : f32 to vector<16x512xf32>
    %65 = arith.select %20, %63, %64 : vector<16x512xi1>, vector<16x512xf32>
    %66 = vector.extract_strided_slice %21 {offsets = [5, 0], sizes = [1, 512], strides = [1, 1]} : vector<9x512xf32> to vector<1x512xf32>
    %67 = vector.shape_cast %66 : vector<1x512xf32> to vector<512xf32>
    %68 = vector.shape_cast %67 : vector<512xf32> to vector<1x512xf32>
    %69 = vector.broadcast %68 : vector<1x512xf32> to vector<16x512xf32>
    %70 = arith.mulf %65, %69 : vector<16x512xf32>
    %71 = arith.addf %62, %70 : vector<16x512xf32>
    %c15_i32 = arith.constant 15 : i32
    %72 = tpu.dynamic_rotate %8 by %c15_i32 dim 0 : vector<16x512xf32>, i32 -> vector<16x512xf32>
    %cst_18 = arith.constant 0.000000e+00 : f32
    %73 = vector.broadcast %cst_18 : f32 to vector<16x512xf32>
    %74 = arith.select %16, %72, %73 : vector<16x512xi1>, vector<16x512xf32>
    %c64_i32_19 = arith.constant 64 : i32
    %75 = tpu.dynamic_rotate %74 by %c64_i32_19 dim 1 : vector<16x512xf32>, i32 -> vector<16x512xf32>
    %cst_20 = arith.constant 0.000000e+00 : f32
    %76 = vector.broadcast %cst_20 : f32 to vector<16x512xf32>
    %77 = arith.select %18, %75, %76 : vector<16x512xi1>, vector<16x512xf32>
    %78 = vector.extract_strided_slice %21 {offsets = [6, 0], sizes = [1, 512], strides = [1, 1]} : vector<9x512xf32> to vector<1x512xf32>
    %79 = vector.shape_cast %78 : vector<1x512xf32> to vector<512xf32>
    %80 = vector.shape_cast %79 : vector<512xf32> to vector<1x512xf32>
    %81 = vector.broadcast %80 : vector<1x512xf32> to vector<16x512xf32>
    %82 = arith.mulf %77, %81 : vector<16x512xf32>
    %83 = arith.addf %71, %82 : vector<16x512xf32>
    %84 = vector.extract_strided_slice %21 {offsets = [7, 0], sizes = [1, 512], strides = [1, 1]} : vector<9x512xf32> to vector<1x512xf32>
    %85 = vector.shape_cast %84 : vector<1x512xf32> to vector<512xf32>
    %86 = vector.shape_cast %85 : vector<512xf32> to vector<1x512xf32>
    %87 = vector.broadcast %86 : vector<1x512xf32> to vector<16x512xf32>
    %88 = arith.mulf %74, %87 : vector<16x512xf32>
    %89 = arith.addf %83, %88 : vector<16x512xf32>
    %c448_i32_21 = arith.constant 448 : i32
    %90 = tpu.dynamic_rotate %74 by %c448_i32_21 dim 1 : vector<16x512xf32>, i32 -> vector<16x512xf32>
    %cst_22 = arith.constant 0.000000e+00 : f32
    %91 = vector.broadcast %cst_22 : f32 to vector<16x512xf32>
    %92 = arith.select %20, %90, %91 : vector<16x512xi1>, vector<16x512xf32>
    %93 = vector.extract_strided_slice %21 {offsets = [8, 0], sizes = [1, 512], strides = [1, 1]} : vector<9x512xf32> to vector<1x512xf32>
    %94 = vector.shape_cast %93 : vector<1x512xf32> to vector<512xf32>
    %95 = vector.shape_cast %94 : vector<512xf32> to vector<1x512xf32>
    %96 = vector.broadcast %95 : vector<1x512xf32> to vector<16x512xf32>
    %97 = arith.mulf %92, %96 : vector<16x512xf32>
    %98 = arith.addf %89, %97 : vector<16x512xf32>
    %c0_23 = arith.constant 0 : index
    %c0_24 = arith.constant 0 : index
    %99 = vector.load %arg5[%c0_23, %c0_24] : memref<1x512xf32, #tpu.memory_space<vmem>>, vector<1x512xf32>
    %100 = vector.broadcast %99 : vector<1x512xf32> to vector<16x512xf32>
    %101 = arith.addf %98, %100 : vector<16x512xf32>
    %cst_25 = arith.constant 0.000000e+00 : f32
    %102 = vector.broadcast %cst_25 : f32 to vector<16x512xf32>
    %103 = arith.maximumf %101, %102 : vector<16x512xf32>
    %104 = arith.truncf %103 : vector<16x512xf32> to vector<16x512xbf16>
    %c0_26 = arith.constant 0 : index
    %c0_27 = arith.constant 0 : index
    %105 = vector.load %arg6[%c0_26, %c0_27] : memref<512x512xbf16, #tpu.memory_space<vmem>>, vector<512x512xbf16>
    %cst_28 = arith.constant dense<0.000000e+00> : vector<16x512xf32>
    %106 = tpu.matmul %104, %105, %cst_28 {dimension_numbers = #tpu.dot_dimension_numbers<[1], [0], [0], [1], [0, 0, 1, 1], [], []>} : vector<16x512xbf16>, vector<512x512xbf16>, vector<16x512xf32> -> vector<16x512xf32>
    %c0_29 = arith.constant 0 : index
    %c0_30 = arith.constant 0 : index
    %107 = vector.load %arg7[%c0_29, %c0_30] : memref<1x512xf32, #tpu.memory_space<vmem>>, vector<1x512xf32>
    %108 = vector.broadcast %107 : vector<1x512xf32> to vector<16x512xf32>
    %109 = arith.addf %106, %108 : vector<16x512xf32>
    %110 = arith.addf %109, %0 : vector<16x512xf32>
    %cst_31 = arith.constant 0.000000e+00 : f32
    %111 = vector.broadcast %cst_31 : f32 to vector<16x512xf32>
    %112 = arith.maximumf %110, %111 : vector<16x512xf32>
    %c0_32 = arith.constant 0 : index
    %c0_33 = arith.constant 0 : index
    %113 = vector.load %arg8[%c0_32, %c0_33] : memref<16x512xf32, #tpu.memory_space<vmem>>, vector<16x512xf32>
    tpu.vector_store %arg8[%c0_32, %c0_33], %112 {strides = array<i32>} : memref<16x512xf32, #tpu.memory_space<vmem>>, vector<16x512xf32>,
    return
  }
  func.func @transform_0(%arg0: i32) -> (i32, i32) {
    %c0_i32 = arith.constant 0 : i32
    %c0_i32_0 = arith.constant 0 : i32
    return %arg0, %c0_i32 : i32, i32
  }
  func.func @transform_1(%arg0: i32) -> (i32, i32) {
    %c0_i32 = arith.constant 0 : i32
    %c0_i32_0 = arith.constant 0 : i32
    %c0_i32_1 = arith.constant 0 : i32
    return %c0_i32, %c0_i32_0 : i32, i32
  }
  func.func @transform_2(%arg0: i32) -> (i32, i32) {
    %c0_i32 = arith.constant 0 : i32
    %c0_i32_0 = arith.constant 0 : i32
    %c0_i32_1 = arith.constant 0 : i32
    return %c0_i32, %c0_i32_0 : i32, i32
  }
  func.func @transform_3(%arg0: i32) -> (i32, i32) {
    %c0_i32 = arith.constant 0 : i32
    %c0_i32_0 = arith.constant 0 : i32
    %c0_i32_1 = arith.constant 0 : i32
    return %c0_i32, %c0_i32_0 : i32, i32
  }
  func.func @transform_4(%arg0: i32) -> (i32, i32) {
    %c0_i32 = arith.constant 0 : i32
    %c0_i32_0 = arith.constant 0 : i32
    %c0_i32_1 = arith.constant 0 : i32
    return %c0_i32, %c0_i32_0 : i32, i32
  }
  func.func @transform_5(%arg0: i32) -> (i32, i32) {
    %c0_i32 = arith.constant 0 : i32
    %c0_i32_0 = arith.constant 0 : i32
    %c0_i32_1 = arith.constant 0 : i32
    return %c0_i32, %c0_i32_0 : i32, i32
  }
  func.func @transform_6(%arg0: i32) -> (i32, i32) {
    %c0_i32 = arith.constant 0 : i32
    %c0_i32_0 = arith.constant 0 : i32
    %c0_i32_1 = arith.constant 0 : i32
    return %c0_i32, %c0_i32_0 : i32, i32
  }
  func.func @transform_7(%arg0: i32) -> (i32, i32) {
    %c0_i32 = arith.constant 0 : i32
    %c0_i32_0 = arith.constant 0 : i32
    return %arg0, %c0_i32 : i32, i32
  }
}

</mosaic_0001>

<bundles_post_ra>
// kernel: tpu_custom_call.1
= control target key start
LH: loop header
LB: loop body
LE: loop exit
PB: predicated region body
PF: predicated region fallthrough
CT: control target
= control target key end

     0   :  { %s4916_s0 = inlined_call_operand.hbm [shape: f32[32,512], index: 0, kind: input, shape index: {}]   ;;  %s4917_s1 = inlined_call_operand.hbm [shape: bf16[512,512], index: 1, kind: input, shape index: {}]   ;;  %s4918_s2 = inlined_call_operand.vmem [shape: f32[1,512], index: 2, kind: input, shape index: {}]   ;;  %s4919_s3 = inlined_call_operand.hbm [shape: f32[9,512], index: 3, kind: input, shape index: {}]   ;;  %s4920_s4 = inlined_call_operand.vmem [shape: f32[1,512], index: 4, kind: input, shape index: {}]   ;;  %s4921_s5 = inlined_call_operand.hbm [shape: bf16[512,512], index: 5, kind: input, shape index: {}]   ;;  %s4922_s6 = inlined_call_operand.vmem [shape: f32[1,512], index: 6, kind: input, shape index: {}]   ;;  %s4923_s7 = inlined_call_operand.hbm [shape: f32[32,512], index: 7, kind: output, shape index: {}]  }
   0x1   :  { %4940 = sst [smem:[#allocation36_spill]] %s4917_s1 }
   0x2   :  { %12 = vsyncpa [#allocation3], 0 }
   0x3   :  { %14 = vsyncpa [#allocation3 + $0x1], 0 }
   0x4   :  { %15 = vsyncpa [#allocation6], 0 }
   0x5   :  { %16 = vsyncpa [#allocation9], 0 }
   0x6   :  { %17 = vsyncpa [#allocation4], 0 }
   0x7   :  { %19 = vsyncpa [#allocation4 + $0x1], 0  ;;  %s3988_s24 = smov 0   ;;  %s3990_s25 = smov 0  }
   0x8   :  { %s3992_s26 = smov 0   ;;  %s3994_s27 = smov 0  }
   0x9 LB: > { %s4009_s28 = sadd.s32 4294967295, %s3934_s27   ;;  %s2952_s29 = sadd.s32 4294967294, %s3934_s27   ;;  %s3934_s27 = sphi %s3994_s27, %s5013_s27   ;;  %s3930_s26 = sphi %s3992_s26, %s5012_s26   ;;  %s3926_s25 = sphi %s3990_s25, %s5011_s25   ;;  %s3922_s24 = sphi %s3988_s24, %s5010_s24  }
   0xa   : > { %p45_p0 = scmp.ne.s32.totalorder %s3926_s25, %s3922_s24  ;;  %p4924_p1 = scmp.eq.s32.totalorder %s4009_s28, 0 }
   0xb   : > { %p201_p3 = scmp.eq.s32.totalorder %s2952_s29, 1  ;;  %p2953_p5 = scmp.ge.s32.totalorder %s3934_s27, 1 }
   0xc   : > { %p4018_p4 = por %p4924_p1, %p45_p0  ;;  %p208_p7 = scmp.lt.s32.totalorder %s3934_s27, 3 }
   0xd   : > { %p4023_p6 = por %p201_p3, %p45_p0  ;;  %s3936_s10 = smov [#allocation5]  }
   0xe   : > { %s4941_s30 = scalar_select %p4018_p4, 1, 0 }
   0xf   : > { %s4942_s8 = scalar_select %p4023_p6, 1, 0 }
  0x10   : > { %p4028_p8 = pnand %p2953_p5, %p208_p7  ;;  %s220_s11 = sshll.u32 %s3936_s10, 4  ;;  %s4032_s11 = int_to_ptr.vmem [resolvable:$true] %s220_s11 }
  0x11   : > { %4943 = sst [smem:[#allocation15_spill]] %s4942_s8  ;;  %s3937_s13 = smov [#allocation7]  }
  0x12   : > { %s4944_s9 = scalar_select %p4028_p8, 1, 0 }
  0x13   : > { %p3286_p9 = pneg %p4028_p8  ;;  %s236_s14 = sshll.u32 %s3937_s13, 4  ;;  %s4043_s14 = int_to_ptr.vmem [resolvable:$true] %s236_s14 }
  0x14   : > { %s4946_s1 = sld [smem:[#allocation36_spill]] }
  0x15   : > { %p4039_p11 = pnand %p3286_p9, %p4924_p1 }
  0x17   : > { %p4053_p13 = pneg %p4039_p11 }
  0x1a   : > { %s3746_s17 = scalar_lea.hbm %s4946_s1, 16384 }
  0x1b   : > { %p3747_p12 = scmp.ne.s32.totalorder %s4946_s1, %s3746_s17  ;;  %p3753_p5 = scmp.lt.u32.totalorder %s3746_s17, %s4946_s1 }
  0x1d   : > { %p3749_p0 = pnand %p4053_p13, %p3747_p12 }
  0x1f   : > { %p3750_p3 = pneg %p3749_p0 }
  0x21   : > { %p3755_p7 = pnand %p3753_p5, %p3750_p3 }
  0x23   : > { %3758 = shalt.err (!%p3755_p7)
}
  0x24   : > { %s3759_s23 = scalar_lea.vmem %s4032_s11, 16384  ;;  %p3767_p2 = scmp.lt.s32.totalorder %s4032_s11, %s4032_s11 }
  0x25   : > { %p3760_p9 = scmp.ne.s32.totalorder %s4032_s11, %s3759_s23  ;;  %p3768_p6 = scmp.lt.s32.totalorder %s3759_s23, %s3759_s23 }
  0x27   : > { %p3762_p10 = pnand %p3760_p9, %p4053_p13  ;;  %p3769_p12 = por %p3768_p6, %p3767_p2 }
  0x29   : > { %p3763_p1 = pneg %p3762_p10 }
  0x2b   : > { %p3770_p0 = pnand %p3769_p12, %p3763_p1 }
  0x2d   : > { %3773 = shalt.err (!%p3770_p0)
}
  0x2e   : > { %s4925_s29 = smov 256   ;;  %s4926_s10 = smov 16  }
  0x2f   : > { %3289 = dma.hbm_to_vmem [thread:$0]  (!%p4039_p11), %s4946_s1, 16384, %s4032_s11, [#allocation6], %s4925_s29, %s4925_s29, %s4926_s10  }
  0x30   : > { %s3774_s18 = scalar_lea.hbm %s4919_s3, 1024 }
  0x31   : > { %p3775_p1 = scmp.ne.s32.totalorder %s4919_s3, %s3774_s18  ;;  %p3781_p10 = scmp.lt.u32.totalorder %s3774_s18, %s4919_s3 }
  0x33   : > { %p3777_p2 = pnand %p3775_p1, %p4053_p13 }
  0x35   : > { %p3778_p6 = pneg %p3777_p2 }
  0x37   : > { %p3783_p3 = pnand %p3781_p10, %p3778_p6 }
  0x39   : > { %3786 = shalt.err (!%p3783_p3)
}
  0x3a   : > { %s3787_s11 = scalar_lea.vmem %s4043_s14, 1024  ;;  %p3795_p12 = scmp.lt.s32.totalorder %s4043_s14, %s4043_s14 }
  0x3b   : > { %p3788_p5 = scmp.ne.s32.totalorder %s4043_s14, %s3787_s11  ;;  %p3796_p0 = scmp.lt.s32.totalorder %s3787_s11, %s3787_s11 }
  0x3d   : > { %p3790_p7 = pnand %p3788_p5, %p4053_p13  ;;  %p3797_p1 = por %p3796_p0, %p3795_p12 }
  0x3f   : > { %p3791_p9 = pneg %p3790_p7 }
  0x41   : > { %p3798_p2 = pnand %p3797_p1, %p3791_p9 }
  0x43   : > { %3801 = shalt.err (!%p3798_p2)
}
  0x44   : > { %s3940_s13 = smov 512   ;;  %s3941_s15 = smov 32  }
  0x45   : > { %3292 = dma.hbm_to_vmem [thread:$0]  (!%p4039_p11), %s4919_s3, 1024, %s4043_s14, [#allocation6], %s3940_s13, %s3940_s13, %s3941_s15  }
  0x46   : > { %s3942_s18 = smov [#allocation8]   ;;  %s4104_s21 = sadd.s32 1, %s3934_s27  }
  0x47   : > { %s252_s19 = sshll.u32 %s3942_s18, 4  ;;  %s3802_s11 = scalar_lea.hbm %s4921_s5, 16384  ;;  %s253_s19 = int_to_ptr.vmem [resolvable:$true] %s252_s19 }
  0x48   : > { %p3803_p6 = scmp.ne.s32.totalorder %s4921_s5, %s3802_s11  ;;  %p3809_p5 = scmp.lt.u32.totalorder %s3802_s11, %s4921_s5 }
  0x4a   : > { %p3805_p10 = pnand %p3803_p6, %p4053_p13 }
  0x4c   : > { %p3806_p3 = pneg %p3805_p10 }
  0x4e   : > { %p3811_p7 = pnand %p3809_p5, %p3806_p3 }
  0x50   : > { %3814 = shalt.err (!%p3811_p7)
}
  0x51   : > { %s3815_s14 = scalar_lea.vmem %s253_s19, 16384  ;;  %p3823_p1 = scmp.lt.s32.totalorder %s253_s19, %s253_s19 }
  0x52   : > { %p3816_p9 = scmp.ne.s32.totalorder %s253_s19, %s3815_s14  ;;  %p3824_p2 = scmp.lt.s32.totalorder %s3815_s14, %s3815_s14 }
  0x54   : > { %p3818_p12 = pnand %p3816_p9, %p4053_p13  ;;  %p3825_p4 = por %p3824_p2, %p3823_p1 }
  0x56   : > { %p3819_p0 = pneg %p3818_p12 }
  0x58   : > { %p3826_p8 = pnand %p3825_p4, %p3819_p0 }
  0x5a   : > { %3829 = shalt.err (!%p3826_p8)
}
  0x5b   : > { %s4948_s29 = smov 16   ;;  %s4949_s10 = smov 256  }
  0x5c   : > { %3295 = dma.hbm_to_vmem [thread:$0]  (!%p4039_p11), %s4921_s5, 16384, %s253_s19, [#allocation9], %s4949_s10, %s4949_s10, %s4948_s29  }
  0x5d   : > { %s29_s20 = ssub.s32 %s3934_s27, %s4104_s21  ;;  %s32_s12 = sadd.s32 1, %s3930_s26 }
  0x5e   : > { %p30_p4 = scmp.eq.s32.totalorder %s29_s20, 0  ;;  %p39_p8 = scmp.ne.s32.totalorder %s3930_s26, %s3926_s25 }
  0x5f   : > { %p40_p13 = scmp.eq.s32.totalorder %s3934_s27, 0  ;;  %p3307_p6 = scmp.lt.s32.totalorder %s3934_s27, 2 }
  0x60   : > { %s4135_s16 = scalar_select %p30_p4, %s3930_s26, %s32_s12  }
  0x61   : > { %p41_p10 = por %p40_p13, %p39_p8  ;;  %p4950_p3 = scmp.eq.s32.totalorder %s4009_s28, 1 }
  0x62   : > { %s269_s18 = sand.u32 1, %s3930_s26   ;;  %s3235_s22 = sshll.u32 %s3934_s27, 10 }
  0x63   : > { %p4139_p5 = por %p4950_p3, %p39_p8  ;;  %s2958_s23 = sshll.u32 %s269_s18, 6 }
  0x64   : > { %s4148_s19 = scalar_lea.hbm %s4916_s0, %s3235_s22  ;;  %s273_s29 = scalar_lea.vmem [#allocation2], %s2958_s23 }
  0x65   : > { %s281_s10 = sshll.u32 %s273_s29, 4  ;;  %p4150_p11 = pnand %p3307_p6, %p41_p10  ;;  %s4154_s10 = int_to_ptr.vmem [resolvable:$true] %s281_s10 }
  0x66   : > { %s4156_s8 = scalar_lea.sflag [#allocation3], %s269_s18  ;;  %s3830_s20 = scalar_lea.hbm %s4148_s19, 1024 }
  0x67   : > { %p3831_p7 = scmp.ne.s32.totalorder %s4148_s19, %s3830_s20  ;;  %p3832_p9 = pneg %p4150_p11 }
  0x68   : > { %s3835_s23 = scalar_lea.hbm %s4916_s0, 2048  ;;  %p3836_p1 = scmp.lt.u32.totalorder %s4148_s19, %s4916_s0 }
  0x69   : > { %p3833_p12 = pnand %p3832_p9, %p3831_p7  ;;  %p3837_p2 = scmp.lt.u32.totalorder %s3835_s23, %s3830_s20 }
  0x6a   : > { %p3839_p8 = scmp.lt.u32.totalorder %s3830_s20, %s4148_s19 }
  0x6b   : > { %p3834_p0 = pneg %p3833_p12  ;;  %p3838_p4 = por %p3837_p2, %p3836_p1 }
  0x6d   : > { %p3840_p13 = por %p3839_p8, %p3838_p4 }
  0x6f   : > { %p3841_p6 = pnand %p3840_p13, %p3834_p0 }
  0x71   : > { %3844 = shalt.err (!%p3841_p6)
}
  0x72   : > { %s3845_s18 = scalar_lea.vmem %s4154_s10, 1024  ;;  %s3943_s29 = smov [#allocation2]  }
  0x73   : > { %p3846_p10 = scmp.ne.s32.totalorder %s4154_s10, %s3845_s18  ;;  %s3850_s12 = sshll.u32 %s3943_s29, 4  ;;  %s3851_s12 = int_to_ptr.vmem [resolvable:$false] %s3850_s12 }
  0x74   : > { %s3852_s22 = scalar_lea.vmem %s3851_s12, 2048  ;;  %p3853_p12 = scmp.lt.s32.totalorder %s4154_s10, %s3851_s12 }
  0x75   : > { %p3848_p3 = pnand %p3846_p10, %p3832_p9  ;;  %p3854_p1 = scmp.lt.s32.totalorder %s3852_s22, %s3845_s18 }
  0x77   : > { %p3849_p7 = pneg %p3848_p3  ;;  %p3855_p2 = por %p3854_p1, %p3853_p12 }
  0x79   : > { %p3856_p4 = pnand %p3855_p2, %p3849_p7 }
  0x7b   : > { %3859 = shalt.err (!%p3856_p4)
}
  0x7c   : > { %3299 = dma.hbm_to_vmem [thread:$0]  (!%p4150_p11), %s4148_s19, 1024, %s4154_s10, %s4156_s8, %s3940_s13, %s3940_s13, %s3941_s15  }
  0x7d   : > { %p4953_p9 = scmp.ne.s32.totalorder %s4944_s9, 0 }
  0x7f   : > { %293 = sbr.rel (%p4953_p9) target bundleno = 968 (0x3c8), region = 48 }
  0x86   : > { %s4190_s20 = sand.u32 1, %s3926_s25   ;;  %p4954_p0 = scmp.ne.s32.totalorder %s4941_s30, 0 }
  0x87   : > { %s2963_s23 = sshll.u32 %s4190_s20, 6  ;;  %s296_s11 = scalar_lea.sflag [#allocation3], %s4190_s20 }
  0x88   : > { %s4196_s1 = scalar_lea.vmem [#allocation2], %s2963_s23 }
  0x89   : > { %3905 = dma.done.wait (%p4954_p0), %s296_s11, 1024  }
  0x8a   : > { %3907 = vsyncadd (%p4954_p0), %s296_s11, 4294966272  ;;  %p4955_p11 = scmp.eq.s32.totalorder %s4009_s28, 0 }
  0x8c   : > { %3909 = dma.done.wait (%p4955_p11), [#allocation6], 17408   ;;  %p4956_p8 = pmov %p4955_p11 }
  0x8e   : > { %3911 = vsyncadd (%p4956_p8), [#allocation6], 4294949888  ;;  %p4957_p13 = pmov %p4956_p8 }
  0x8f   : > { %p4958_p6 = pmov %p4956_p8 }
  0x90   : > { %3913 = dma.done.wait (%p4957_p13), [#allocation9], 16384  }
  0x91   : > { %3915 = vsyncadd (%p4958_p6), [#allocation9], 4294950912  ;;  %v3354_v0 = vld [vmem:[#allocation5 + $0x4] ss:$16 sps:$4 sm:$0xff]   ;;  %v3356_v1 = vld [vmem:[#allocation5 + $0xc] ss:$16 sps:$4 sm:$0xff]  }
  0x92   : > { %1146 = vmatprep.subr.bf16.mxu0 %v3354_v0  ;;  %v3358_v2 = vld [vmem:[#allocation5] ss:$16 sps:$4 sm:$0xff]   ;;  %v3359_v3 = vld [vmem:[#allocation5 + $0x8] ss:$16 sps:$4 sm:$0xff]   ;;  %1232 = vmatprep.subr.bf16.mxu1 %v3356_v1  ;;  %v3360_v4 = vld [vmem:[#allocation5 + $0x24] ss:$16 sps:$4 sm:$0xff]  }
  0x93   : > { %1147 = vmatpush1.bf16.msra.mxu0 %v3358_v2  ;;  %1233 = vmatpush1.bf16.msra.mxu1 %v3359_v3  ;;  %v3362_v5 = vld [vmem:[#allocation5 + $0x2c] ss:$16 sps:$4 sm:$0xff]   ;;  %v3364_v6 = vld [vmem:[#allocation5 + $0x20] ss:$16 sps:$4 sm:$0xff]   ;;  %v3365_v7 = vld [vmem:[#allocation5 + $0x28] ss:$16 sps:$4 sm:$0xff]  }
  0x94   : > { %1148 = vmatprep.subr.bf16.mxu0 %v3360_v4  ;;  %1234 = vmatprep.subr.bf16.mxu1 %v3362_v5  ;;  %v3366_v8 = vld [vmem:[#allocation5 + $0x44] ss:$16 sps:$4 sm:$0xff]   ;;  %v3368_v9 = vld [vmem:[#allocation5 + $0x4c] ss:$16 sps:$4 sm:$0xff]   ;;  %v3370_v10 = vld [vmem:[#allocation5 + $0x40] ss:$16 sps:$4 sm:$0xff]  }
  0x95   : > { %v3371_v11 = vld [vmem:[#allocation5 + $0x48] ss:$16 sps:$4 sm:$0xff]   ;;  %v3372_v12 = vld [vmem:[#allocation5 + $0x64] ss:$16 sps:$4 sm:$0xff]   ;;  %v3374_v13 = vld [vmem:[#allocation5 + $0x6c] ss:$16 sps:$4 sm:$0xff]  }
  0x96   : > { %v3376_v14 = vld [vmem:[#allocation5 + $0x60] ss:$16 sps:$4 sm:$0xff]   ;;  %v3377_v15 = vld [vmem:[#allocation5 + $0x68] ss:$16 sps:$4 sm:$0xff]   ;;  %v3378_v16 = vld [vmem:[#allocation5 + $0x84] ss:$16 sps:$4 sm:$0xff]  }
  0x97   : > { %1149 = vmatpush1.bf16.msra.mxu0 %v3364_v6  ;;  %1235 = vmatpush1.bf16.msra.mxu1 %v3365_v7  ;;  %v3380_v17 = vld [vmem:[#allocation5 + $0x8c] ss:$16 sps:$4 sm:$0xff]   ;;  %v3382_v18 = vld [vmem:[#allocation5 + $0x80] ss:$16 sps:$4 sm:$0xff]   ;;  %v3383_v19 = vld [vmem:[#allocation5 + $0x88] ss:$16 sps:$4 sm:$0xff]  }
  0x98   : > { %1150 = vmatprep.subr.bf16.mxu0 %v3366_v8  ;;  %1236 = vmatprep.subr.bf16.mxu1 %v3368_v9  ;;  %v3384_v20 = vld [vmem:[#allocation5 + $0xa4] ss:$16 sps:$4 sm:$0xff]   ;;  %v3386_v21 = vld [vmem:[#allocation5 + $0xac] ss:$16 sps:$4 sm:$0xff]   ;;  %v3388_v22 = vld [vmem:[#allocation5 + $0xa0] ss:$16 sps:$4 sm:$0xff]  }
  0x99   : > { %v3389_v23 = vld [vmem:[#allocation5 + $0xa8] ss:$16 sps:$4 sm:$0xff]   ;;  %v3390_v24 = vld [vmem:[#allocation5 + $0xc4] ss:$16 sps:$4 sm:$0xff]   ;;  %v3392_v25 = vld [vmem:[#allocation5 + $0xcc] ss:$16 sps:$4 sm:$0xff]  }
  0x9a   : > { %v3394_v26 = vld [vmem:[#allocation5 + $0xc0] ss:$16 sps:$4 sm:$0xff]   ;;  %v3395_v27 = vld [vmem:[#allocation5 + $0xc8] ss:$16 sps:$4 sm:$0xff]   ;;  %v3396_v28 = vld [vmem:[#allocation5 + $0xe4] ss:$16 sps:$4 sm:$0xff]  }
  0x9b   : > { %1151 = vmatpush1.bf16.msra.mxu0 %v3370_v10  ;;  %1237 = vmatpush1.bf16.msra.mxu1 %v3371_v11  ;;  %v3398_v29 = vld [vmem:[#allocation5 + $0xec] ss:$16 sps:$4 sm:$0xff]   ;;  %v3400_v30 = vld [vmem:[#allocation5 + $0xe0] ss:$16 sps:$4 sm:$0xff]   ;;  %v3401_v31 = vld [vmem:[#allocation5 + $0xe8] ss:$16 sps:$4 sm:$0xff]  }
  0x9c   : > { %1152 = vmatprep.subr.bf16.mxu0 %v3372_v12  ;;  %1238 = vmatprep.subr.bf16.mxu1 %v3374_v13  ;;  %v3402_v32 = vld [vmem:[#allocation5 + $0x104] ss:$16 sps:$4 sm:$0xff]   ;;  %v3404_v33 = vld [vmem:[#allocation5 + $0x10c] ss:$16 sps:$4 sm:$0xff]   ;;  %v3406_v34 = vld [vmem:[#allocation5 + $0x100] ss:$16 sps:$4 sm:$0xff]  }
  0x9d   : > { %v3407_v35 = vld [vmem:[#allocation5 + $0x108] ss:$16 sps:$4 sm:$0xff]   ;;  %v3408_v36 = vld [vmem:[#allocation5 + $0x124] ss:$16 sps:$4 sm:$0xff]   ;;  %v3410_v37 = vld [vmem:[#allocation5 + $0x12c] ss:$16 sps:$4 sm:$0xff]  }
  0x9e   : > { %v3412_v38 = vld [vmem:[#allocation5 + $0x120] ss:$16 sps:$4 sm:$0xff]   ;;  %v3413_v39 = vld [vmem:[#allocation5 + $0x128] ss:$16 sps:$4 sm:$0xff]   ;;  %v3414_v40 = vld [vmem:[#allocation5 + $0x144] ss:$16 sps:$4 sm:$0xff]  }
  0x9f   : > { %1153 = vmatpush1.bf16.msra.mxu0 %v3376_v14  ;;  %1239 = vmatpush1.bf16.msra.mxu1 %v3377_v15  ;;  %v3416_v41 = vld [vmem:[#allocation5 + $0x14c] ss:$16 sps:$4 sm:$0xff]   ;;  %v3418_v42 = vld [vmem:[#allocation5 + $0x140] ss:$16 sps:$4 sm:$0xff]   ;;  %v3419_v43 = vld [vmem:[#allocation5 + $0x148] ss:$16 sps:$4 sm:$0xff]  }
  0xa0   : > { %1154 = vmatprep.subr.bf16.mxu0 %v3378_v16  ;;  %1240 = vmatprep.subr.bf16.mxu1 %v3380_v17  ;;  %v3420_v44 = vld [vmem:[#allocation5 + $0x164] ss:$16 sps:$4 sm:$0xff]   ;;  %v3422_v45 = vld [vmem:[#allocation5 + $0x16c] ss:$16 sps:$4 sm:$0xff]   ;;  %v3424_v48 = vld [vmem:[#allocation5 + $0x160] ss:$16 sps:$4 sm:$0xff]  }
  0xa1   : > { %v345_v46 = vld [vmem:[%s4196_s1 + $0x8] sm:$0xff]  ;;  %v3426_v51 = vld [vmem:[#allocation5 + $0x184] ss:$16 sps:$4 sm:$0xff]   ;;  %v3430_v53 = vld [vmem:[#allocation5 + $0x180] ss:$16 sps:$4 sm:$0xff]   ;;  %s3944_s13 = smov 64  }
  0xa2   : > { %v349_v47 = vld [vmem:[%s4196_s1 + $0x28] sm:$0xff]  ;;  %v3432_v55 = vld [vmem:[#allocation5 + $0x1a4] ss:$16 sps:$4 sm:$0xff]   ;;  %v3436_v57 = vld [vmem:[#allocation5 + $0x1a0] ss:$16 sps:$4 sm:$0xff]   ;;  %s4848_s14 = scalar_lea.vmem [#allocation10], %s2963_s23 }
  0xa3   : > { %1155 = vmatpush1.bf16.msra.mxu0 %v3382_v18  ;;  %1241 = vmatpush1.bf16.msra.mxu1 %v3383_v19  ;;  %v3425_v49 = vld [vmem:[#allocation5 + $0x168] ss:$16 sps:$4 sm:$0xff]   ;;  %v353_v50 = vpack.c.bf16 %v349_v47, %v345_v46  ;;  %v3428_v52 = vld [vmem:[#allocation5 + $0x18c] ss:$16 sps:$4 sm:$0xff]   ;;  %v3438_v59 = vld [vmem:[#allocation5 + $0x1c4] ss:$16 sps:$4 sm:$0xff]  }
  0xa4   : > { %1156 = vmatprep.subr.bf16.mxu0 %v3384_v20  ;;  %1242 = vmatprep.subr.bf16.mxu1 %v3386_v21  ;;  %v3431_v54 = vld [vmem:[#allocation5 + $0x188] ss:$16 sps:$4 sm:$0xff]   ;;  %v3434_v56 = vld [vmem:[#allocation5 + $0x1ac] ss:$16 sps:$4 sm:$0xff]   ;;  %v3442_v61 = vld [vmem:[#allocation5 + $0x1c0] ss:$16 sps:$4 sm:$0xff]  }
  0xa5   : > { %1178 = vmatprep.mubr.bf16.mxu0 %v353_v50  ;;  %1264 = vmatprep.mubr.bf16.mxu1 %v353_v50  ;;  %v3437_v58 = vld [vmem:[#allocation5 + $0x1a8] ss:$16 sps:$4 sm:$0xff]   ;;  %v3440_v60 = vld [vmem:[#allocation5 + $0x1cc] ss:$16 sps:$4 sm:$0xff]   ;;  %v3444_v63 = vld [vmem:[#allocation5 + $0x1e4] ss:$16 sps:$4 sm:$0xff]  }
  0xa6   : > { %v3443_v62 = vld [vmem:[#allocation5 + $0x1c8] ss:$16 sps:$4 sm:$0xff]   ;;  %v3446_v0 = vld [vmem:[#allocation5 + $0x1ec] ss:$16 sps:$4 sm:$0xff]   ;;  %v3448_v1 = vld [vmem:[#allocation5 + $0x1e0] ss:$16 sps:$4 sm:$0xff]  }
  0xa7   : > { %1157 = vmatpush1.bf16.msra.mxu0 %v3388_v22  ;;  %1243 = vmatpush1.bf16.msra.mxu1 %v3389_v23  ;;  %v3449_v2 = vld [vmem:[#allocation5 + $0x1e8] ss:$16 sps:$4 sm:$0xff]   ;;  %v3452_v3 = vld [vmem:[#allocation5 + $0x204] ss:$16 sps:$4 sm:$0xff]   ;;  %v3455_v6 = vld [vmem:[#allocation5 + $0x20c] ss:$16 sps:$4 sm:$0xff]  }
  0xa8   : > { %1158 = vmatprep.subr.bf16.mxu0 %v3390_v24  ;;  %1244 = vmatprep.subr.bf16.mxu1 %v3392_v25  ;;  %v344_v4 = vld [vmem:[%s4196_s1] sm:$0xff]  ;;  %v3453_v8 = vld [vmem:[#allocation5 + $0x208] ss:$16 sps:$4 sm:$0xff]   ;;  %v3461_v11 = vld [vmem:[#allocation5 + $0x22c] ss:$16 sps:$4 sm:$0xff]   ;;  %s2850_s18 = sshll.u32 %s4848_s14, 4  ;;  %s4857_s18 = int_to_ptr.vmem [resolvable:$true] %s2850_s18 }
  0xa9   : > { %v348_v5 = vld [vmem:[%s4196_s1 + $0x20] sm:$0xff]  ;;  %v3459_v13 = vld [vmem:[#allocation5 + $0x228] ss:$16 sps:$4 sm:$0xff]   ;;  %v3467_v15 = vld [vmem:[#allocation5 + $0x24c] ss:$16 sps:$4 sm:$0xff]   ;;  %s3237_s29 = sshll.u32 %s4009_s28, 10 }
  0xaa   : > { %v3450_v7 = vld [vmem:[#allocation5 + $0x200] ss:$16 sps:$4 sm:$0xff]   ;;  %v352_v9 = vpack.c.bf16 %v348_v5, %v344_v4  ;;  %v3458_v10 = vld [vmem:[#allocation5 + $0x224] ss:$16 sps:$4 sm:$0xff]   ;;  %v3465_v17 = vld [vmem:[#allocation5 + $0x248] ss:$16 sps:$4 sm:$0xff]   ;;  %s4866_s22 = scalar_lea.hbm %s4923_s7, %s3237_s29 }
  0xab   : > { %1159 = vmatpush1.bf16.msra.mxu0 %v3394_v26  ;;  %1245 = vmatpush1.bf16.msra.mxu1 %v3395_v27  ;;  %v3456_v12 = vld [vmem:[#allocation5 + $0x220] ss:$16 sps:$4 sm:$0xff]   ;;  %v3464_v14 = vld [vmem:[#allocation5 + $0x244] ss:$16 sps:$4 sm:$0xff]   ;;  %v3473_v19 = vld [vmem:[#allocation5 + $0x26c] ss:$16 sps:$4 sm:$0xff]  }
  0xac   : > { %1160 = vmatprep.subr.bf16.mxu0 %v3396_v28  ;;  %1246 = vmatprep.subr.bf16.mxu1 %v3398_v29  ;;  %v3462_v16 = vld [vmem:[#allocation5 + $0x240] ss:$16 sps:$4 sm:$0xff]   ;;  %v3470_v18 = vld [vmem:[#allocation5 + $0x264] ss:$16 sps:$4 sm:$0xff]   ;;  %v3471_v21 = vld [vmem:[#allocation5 + $0x268] ss:$16 sps:$4 sm:$0xff]  }
  0xad   : > { %v3468_v20 = vld [vmem:[#allocation5 + $0x260] ss:$16 sps:$4 sm:$0xff]   ;;  %v3476_v22 = vld [vmem:[#allocation5 + $0x284] ss:$16 sps:$4 sm:$0xff]   ;;  %v3479_v23 = vld [vmem:[#allocation5 + $0x28c] ss:$16 sps:$4 sm:$0xff]  }
  0xae   : > { %v3474_v24 = vld [vmem:[#allocation5 + $0x280] ss:$16 sps:$4 sm:$0xff]   ;;  %v3477_v25 = vld [vmem:[#allocation5 + $0x288] ss:$16 sps:$4 sm:$0xff]   ;;  %v3482_v26 = vld [vmem:[#allocation5 + $0x2a4] ss:$16 sps:$4 sm:$0xff]  }
  0xaf   : > { %1161 = vmatpush1.bf16.msra.mxu0 %v3400_v30  ;;  %1247 = vmatpush1.bf16.msra.mxu1 %v3401_v31  ;;  %v3485_v27 = vld [vmem:[#allocation5 + $0x2ac] ss:$16 sps:$4 sm:$0xff]   ;;  %v3480_v28 = vld [vmem:[#allocation5 + $0x2a0] ss:$16 sps:$4 sm:$0xff]   ;;  %v3483_v29 = vld [vmem:[#allocation5 + $0x2a8] ss:$16 sps:$4 sm:$0xff]  }
  0xb0   : > { %1162 = vmatprep.subr.bf16.mxu0 %v3402_v32  ;;  %1248 = vmatprep.subr.bf16.mxu1 %v3404_v33  ;;  %v3488_v30 = vld [vmem:[#allocation5 + $0x2c4] ss:$16 sps:$4 sm:$0xff]   ;;  %v3491_v31 = vld [vmem:[#allocation5 + $0x2cc] ss:$16 sps:$4 sm:$0xff]   ;;  %v3486_v32 = vld [vmem:[#allocation5 + $0x2c0] ss:$16 sps:$4 sm:$0xff]  }
  0xb1   : > { %v347_v33 = vld [vmem:[%s4196_s1 + $0x18] sm:$0xff]  ;;  %v3504_v47 = vld [vmem:[#allocation5 + $0x320] ss:$16 sps:$4 sm:$0xff]   ;;  %v3542_v5 = vld [vmem:[#allocation5 + $0x3e4] ss:$16 sps:$4 sm:$0xff]   ;;  %s2836_s23 = scalar_lea.sflag [#allocation4], %s4190_s20 }
  0xb2   : > { %v3509_v46 = vld [vmem:[#allocation5 + $0x32c] ss:$16 sps:$4 sm:$0xff]   ;;  %v3537_v4 = vld [vmem:[#allocation5 + $0x3c8] ss:$16 sps:$4 sm:$0xff]   ;;  %s3860_s11 = scalar_lea.vmem %s4857_s18, 1024 }
  0xb3   : > { %1163 = vmatpush1.bf16.msra.mxu0 %v3406_v34  ;;  %1249 = vmatpush1.bf16.msra.mxu1 %v3407_v35  ;;  %v3489_v34 = vld [vmem:[#allocation5 + $0x2c8] ss:$16 sps:$4 sm:$0xff]   ;;  %v3494_v35 = vld [vmem:[#allocation5 + $0x2e4] ss:$16 sps:$4 sm:$0xff]   ;;  %v3515_v50 = vld [vmem:[#allocation5 + $0x34c] ss:$16 sps:$4 sm:$0xff]   ;;  %p3861_p10 = scmp.ne.s32.totalorder %s4857_s18, %s3860_s11 }
  0xb4   : > { %1164 = vmatprep.subr.bf16.mxu0 %v3408_v36  ;;  %1250 = vmatprep.subr.bf16.mxu1 %v3410_v37  ;;  %v351_v36 = vld [vmem:[%s4196_s1 + $0x38] sm:$0xff] }
  0xb5   : > { %v3497_v37 = vld [vmem:[#allocation5 + $0x2ec] ss:$16 sps:$4 sm:$0xff]   ;;  %p3862_p3 = pnand %p3861_p10, %p4139_p5 }
  0xb7   : > { %1165 = vmatpush1.bf16.msra.mxu0 %v3412_v38  ;;  %1251 = vmatpush1.bf16.msra.mxu1 %v3413_v39  ;;  %v355_v38 = vpack.c.bf16 %v351_v36, %v347_v33  ;;  %v3492_v39 = vld [vmem:[#allocation5 + $0x2e0] ss:$16 sps:$4 sm:$0xff]   ;;  %v3569_v33 = vld [vmem:[#allocation8 + $0x6c] ss:$16 sps:$4 sm:$0xff]   ;;  %p3863_p7 = pneg %p3862_p3 }
  0xb8   : > { %1166 = vmatprep.subr.bf16.mxu0 %v3414_v40  ;;  %1252 = vmatprep.subr.bf16.mxu1 %v3416_v41  ;;  %v3495_v40 = vld [vmem:[#allocation5 + $0x2e8] ss:$16 sps:$4 sm:$0xff]   ;;  %v3500_v41 = vld [vmem:[#allocation5 + $0x304] ss:$16 sps:$4 sm:$0xff]  }
  0xbb   : > { %1167 = vmatpush1.bf16.msra.mxu0 %v3418_v42  ;;  %1253 = vmatpush1.bf16.msra.mxu1 %v3419_v43  ;;  %v3503_v42 = vld [vmem:[#allocation5 + $0x30c] ss:$16 sps:$4 sm:$0xff]   ;;  %v3498_v43 = vld [vmem:[#allocation5 + $0x300] ss:$16 sps:$4 sm:$0xff]  }
  0xbc   : > { %1168 = vmatprep.subr.bf16.mxu0 %v3420_v44  ;;  %1254 = vmatprep.subr.bf16.mxu1 %v3422_v45  ;;  %v3501_v44 = vld [vmem:[#allocation5 + $0x308] ss:$16 sps:$4 sm:$0xff]   ;;  %v3506_v45 = vld [vmem:[#allocation5 + $0x324] ss:$16 sps:$4 sm:$0xff]  }
  0xbf   : > { %1169 = vmatpush1.bf16.msra.mxu0 %v3424_v48  ;;  %1255 = vmatpush1.bf16.msra.mxu1 %v3425_v49  ;;  %v3507_v48 = vld [vmem:[#allocation5 + $0x328] ss:$16 sps:$4 sm:$0xff]   ;;  %v3512_v49 = vld [vmem:[#allocation5 + $0x344] ss:$16 sps:$4 sm:$0xff]  }
  0xc0   : > { %1170 = vmatprep.subr.bf16.mxu0 %v3426_v51  ;;  %1256 = vmatprep.subr.bf16.mxu1 %v3428_v52  ;;  %v3510_v51 = vld [vmem:[#allocation5 + $0x340] ss:$16 sps:$4 sm:$0xff]   ;;  %v3513_v52 = vld [vmem:[#allocation5 + $0x348] ss:$16 sps:$4 sm:$0xff]  }
  0xc3   : > { %1171 = vmatpush1.bf16.msra.mxu0 %v3430_v53  ;;  %1257 = vmatpush1.bf16.msra.mxu1 %v3431_v54  ;;  %v3518_v53 = vld [vmem:[#allocation5 + $0x364] ss:$16 sps:$4 sm:$0xff]   ;;  %v3521_v54 = vld [vmem:[#allocation5 + $0x36c] ss:$16 sps:$4 sm:$0xff]  }
  0xc4   : > { %1172 = vmatprep.subr.bf16.mxu0 %v3432_v55  ;;  %1258 = vmatprep.subr.bf16.mxu1 %v3434_v56  ;;  %v3516_v55 = vld [vmem:[#allocation5 + $0x360] ss:$16 sps:$4 sm:$0xff]   ;;  %v3519_v56 = vld [vmem:[#allocation5 + $0x368] ss:$16 sps:$4 sm:$0xff]  }
  0xc7   : > { %1173 = vmatpush1.bf16.msra.mxu0 %v3436_v57  ;;  %1259 = vmatpush1.bf16.msra.mxu1 %v3437_v58  ;;  %v3524_v57 = vld [vmem:[#allocation5 + $0x384] ss:$16 sps:$4 sm:$0xff]   ;;  %v3527_v58 = vld [vmem:[#allocation5 + $0x38c] ss:$16 sps:$4 sm:$0xff]  }
  0xc8   : > { %1174 = vmatprep.subr.bf16.mxu0 %v3438_v59  ;;  %1260 = vmatprep.subr.bf16.mxu1 %v3440_v60  ;;  %v3522_v59 = vld [vmem:[#allocation5 + $0x380] ss:$16 sps:$4 sm:$0xff]   ;;  %v3525_v60 = vld [vmem:[#allocation5 + $0x388] ss:$16 sps:$4 sm:$0xff]  }
  0xcb   : > { %1175 = vmatpush1.bf16.msra.mxu0 %v3442_v61  ;;  %1261 = vmatpush1.bf16.msra.mxu1 %v3443_v62  ;;  %v3530_v61 = vld [vmem:[#allocation5 + $0x3a4] ss:$16 sps:$4 sm:$0xff]   ;;  %v3533_v62 = vld [vmem:[#allocation5 + $0x3ac] ss:$16 sps:$4 sm:$0xff]  }
  0xcc   : > { %1176 = vmatprep.subr.bf16.mxu0 %v3444_v63  ;;  %1262 = vmatprep.subr.bf16.mxu1 %v3446_v0  ;;  %v3528_v63 = vld [vmem:[#allocation5 + $0x3a0] ss:$16 sps:$4 sm:$0xff]   ;;  %v3531_v0 = vld [vmem:[#allocation5 + $0x3a8] ss:$16 sps:$4 sm:$0xff]  }
  0xcf   : > { %1177 = vmatpush1.bf16.msra.mxu0 %v3448_v1  ;;  %1263 = vmatpush1.bf16.msra.mxu1 %v3449_v2  ;;  %v3536_v1 = vld [vmem:[#allocation5 + $0x3c4] ss:$16 sps:$4 sm:$0xff]   ;;  %v3539_v2 = vld [vmem:[#allocation5 + $0x3cc] ss:$16 sps:$4 sm:$0xff]  }
  0xd0   : > { %1189 = vmatprep.subr.bf16.mxu0 %v3452_v3  ;;  %1275 = vmatprep.subr.bf16.mxu1 %v3455_v6  ;;  %v3534_v3 = vld [vmem:[#allocation5 + $0x3c0] ss:$16 sps:$4 sm:$0xff]   ;;  %v3545_v6 = vld [vmem:[#allocation5 + $0x3ec] ss:$16 sps:$4 sm:$0xff]  }
  0xd2   : > { %1179 = vmatmul.mubr.bf16.vlgmr.msra.gmra.mrb[0].mxu0 %v352_v9  ;;  %1265 = vmatmul.mubr.bf16.vlgmr.msra.gmra.mrb[0].mxu1 %v352_v9  ;;  %v346_v9 = vld [vmem:[%s4196_s1 + $0x10] sm:$0xff] }
  0xd3   : > { %1190 = vmatpush1.bf16.msra.mxu0 %v3450_v7  ;;  %1276 = vmatpush1.bf16.msra.mxu1 %v3453_v8  ;;  %v3540_v7 = vld [vmem:[#allocation5 + $0x3e0] ss:$16 sps:$4 sm:$0xff]   ;;  %v3543_v8 = vld [vmem:[#allocation5 + $0x3e8] ss:$16 sps:$4 sm:$0xff]  }
  0xd4   : > { %1191 = vmatprep.subr.bf16.mxu0 %v3458_v10  ;;  %1277 = vmatprep.subr.bf16.mxu1 %v3461_v11  ;;  %v350_v10 = vld [vmem:[%s4196_s1 + $0x30] sm:$0xff] }
  0xd5   : > { %1221 = vmatprep.mubr.bf16.mxu0 %v355_v38  ;;  %1307 = vmatprep.mubr.bf16.mxu1 %v355_v38  ;;  %v354_v11 = vpack.c.bf16 %v350_v10, %v346_v9  ;;  %v3579_v10 = vld [vmem:[#allocation8 + $0xa8] ss:$16 sps:$4 sm:$0xff]  }
  0xd7   : > { %1192 = vmatpush1.bf16.msra.mxu0 %v3456_v12  ;;  %1278 = vmatpush1.bf16.msra.mxu1 %v3459_v13  ;;  %v3546_v12 = vld [vmem:[#allocation8] ss:$16 sps:$4 sm:$0xff]   ;;  %v3548_v13 = vld [vmem:[#allocation8 + $0x4] ss:$16 sps:$4 sm:$0xff]  }
  0xd8   : > { %1193 = vmatprep.subr.bf16.mxu0 %v3464_v14  ;;  %1279 = vmatprep.subr.bf16.mxu1 %v3467_v15  ;;  %v3549_v14 = vld [vmem:[#allocation8 + $0x8] ss:$16 sps:$4 sm:$0xff]   ;;  %v3551_v15 = vld [vmem:[#allocation8 + $0xc] ss:$16 sps:$4 sm:$0xff]  }
  0xdb   : > { %1194 = vmatpush1.bf16.msra.mxu0 %v3462_v16  ;;  %1280 = vmatpush1.bf16.msra.mxu1 %v3465_v17  ;;  %v3554_v16 = vld [vmem:[#allocation8 + $0x24] ss:$16 sps:$4 sm:$0xff]   ;;  %v3557_v17 = vld [vmem:[#allocation8 + $0x2c] ss:$16 sps:$4 sm:$0xff]  }
  0xdc   : > { %1195 = vmatprep.subr.bf16.mxu0 %v3470_v18  ;;  %1281 = vmatprep.subr.bf16.mxu1 %v3473_v19  ;;  %v3552_v18 = vld [vmem:[#allocation8 + $0x20] ss:$16 sps:$4 sm:$0xff]   ;;  %v3555_v19 = vld [vmem:[#allocation8 + $0x28] ss:$16 sps:$4 sm:$0xff]  }
  0xdf   : > { %1196 = vmatpush1.bf16.msra.mxu0 %v3468_v20  ;;  %1282 = vmatpush1.bf16.msra.mxu1 %v3471_v21  ;;  %v486_v20 = vlaneseq }
  0xe0   : > { %1197 = vmatprep.subr.bf16.mxu0 %v3476_v22  ;;  %1283 = vmatprep.subr.bf16.mxu1 %v3479_v23  ;;  %v3558_v22 = vld [vmem:[#allocation8 + $0x40] ss:$16 sps:$4 sm:$0xff]   ;;  %v3560_v23 = vld [vmem:[#allocation8 + $0x44] ss:$16 sps:$4 sm:$0xff]  }
  0xe1   : > { %v4219_v21 = vshrl.u32 %v486_v20, 7 }
  0xe3   : > { %1198 = vmatpush1.bf16.msra.mxu0 %v3474_v24  ;;  %1284 = vmatpush1.bf16.msra.mxu1 %v3477_v25  ;;  %v3561_v24 = vld [vmem:[#allocation8 + $0x48] ss:$16 sps:$4 sm:$0xff]   ;;  %v3563_v25 = vld [vmem:[#allocation8 + $0x4c] ss:$16 sps:$4 sm:$0xff]   ;;  %vm1364_vm0 = vcmp.lt.s32.totalorder %v4219_v21, 1  ;;  %vm1654_vm1 = vcmp.lt.s32.totalorder %v4219_v21, 7 }
  0xe4   : > { %1199 = vmatprep.subr.bf16.mxu0 %v3482_v26  ;;  %1285 = vmatprep.subr.bf16.mxu1 %v3485_v27  ;;  %v4222_v26 = vsub.s32 0, %v4219_v21  ;;  %v4225_v27 = vsub.s32 2, %v4219_v21 }
  0xe6   : > { %4959 = vst [vmem:[#allocation16_spill] sm:$0xff] %v4222_v26  ;;  %4960 = vst [vmem:[#allocation17_spill] sm:$0xff] %v4225_v27 }
  0xe7   : > { %1200 = vmatpush1.bf16.msra.mxu0 %v3480_v28  ;;  %1286 = vmatpush1.bf16.msra.mxu1 %v3483_v29  ;;  %v484_v28 = vld [vmem:[%s4918_s2] sm:$0xf]  ;;  %v4231_v29 = vsub.s32 1, %v4219_v21 }
  0xe8   : > { %1201 = vmatprep.subr.bf16.mxu0 %v3488_v30  ;;  %1287 = vmatprep.subr.bf16.mxu1 %v3491_v31  ;;  %v3564_v30 = vld [vmem:[#allocation8 + $0x60] ss:$16 sps:$4 sm:$0xff]   ;;  %v3566_v31 = vld [vmem:[#allocation8 + $0x64] ss:$16 sps:$4 sm:$0xff]   ;;  %v497_v36 = vrot.slane %v484_v28, %v4225_v27 }
  0xe9   : > { %4961 = vst [vmem:[#allocation18_spill] sm:$0xff] %v4231_v29  ;;  %v493_v38 = vrot.slane %v484_v28, %v4231_v29 }
  0xeb   : > { %1202 = vmatpush1.bf16.msra.mxu0 %v3486_v32  ;;  %1288 = vmatpush1.bf16.msra.mxu1 %v3489_v34  ;;  %v3567_v32 = vld [vmem:[#allocation8 + $0x68] ss:$16 sps:$4 sm:$0xff]   ;;  %v489_v34 = vrot.slane %v484_v28, %v4222_v26 }
  0xec   : > { %1203 = vmatprep.subr.bf16.mxu0 %v3494_v35  ;;  %1289 = vmatprep.subr.bf16.mxu1 %v3497_v37  ;;  %v4235_v35 = vsub.s32 4, %v4219_v21  ;;  %v4238_v37 = vld [vmem:[#allocation7 + $0x10] sm:$0xff] }
  0xef   : > { %1204 = vmatpush1.bf16.msra.mxu0 %v3492_v39  ;;  %1290 = vmatpush1.bf16.msra.mxu1 %v3495_v40  ;;  %v4242_v39 = vsub.s32 3, %v4219_v21 }
  0xf0   : > { %1205 = vmatprep.subr.bf16.mxu0 %v3500_v41  ;;  %1291 = vmatprep.subr.bf16.mxu1 %v3503_v42 }
  0xf1   : > { %4962 = vst [vmem:[#allocation19_spill] sm:$0xff] %v4242_v39 }
  0xf3   : > { %1206 = vmatpush1.bf16.msra.mxu0 %v3498_v43  ;;  %1292 = vmatpush1.bf16.msra.mxu1 %v3501_v44  ;;  %v1585_v44 = vrot.slane %v4238_v37, %v4235_v35 }
  0xf4   : > { %1207 = vmatprep.subr.bf16.mxu0 %v3506_v45  ;;  %1293 = vmatprep.subr.bf16.mxu1 %v3509_v46 }
  0xf7   : > { %1208 = vmatpush1.bf16.msra.mxu0 %v3504_v47  ;;  %1294 = vmatpush1.bf16.msra.mxu1 %v3507_v48  ;;  %v3570_v47 = vld [vmem:[#allocation8 + $0x80] ss:$16 sps:$4 sm:$0xff]   ;;  %v3572_v48 = vld [vmem:[#allocation8 + $0x84] ss:$16 sps:$4 sm:$0xff]  }
  0xf8   : > { %1209 = vmatprep.subr.bf16.mxu0 %v3512_v49  ;;  %1295 = vmatprep.subr.bf16.mxu1 %v3515_v50  ;;  %v501_v50 = vrot.slane %v484_v28, %v4242_v39 }
  0xfb   : > { %1210 = vmatpush1.bf16.msra.mxu0 %v3510_v51  ;;  %1296 = vmatpush1.bf16.msra.mxu1 %v3513_v52 }
  0xfc   : > { %1211 = vmatprep.subr.bf16.mxu0 %v3518_v53  ;;  %1297 = vmatprep.subr.bf16.mxu1 %v3521_v54  ;;  %v3573_v53 = vld [vmem:[#allocation8 + $0x88] ss:$16 sps:$4 sm:$0xff]   ;;  %v3575_v54 = vld [vmem:[#allocation8 + $0x8c] ss:$16 sps:$4 sm:$0xff]  }
  0xff   : > { %1212 = vmatpush1.bf16.msra.mxu0 %v3516_v55  ;;  %1298 = vmatpush1.bf16.msra.mxu1 %v3519_v56 }
 0x100   : > { %1213 = vmatprep.subr.bf16.mxu0 %v3524_v57  ;;  %1299 = vmatprep.subr.bf16.mxu1 %v3527_v58 }
 0x103   : > { %1214 = vmatpush1.bf16.msra.mxu0 %v3522_v59  ;;  %1300 = vmatpush1.bf16.msra.mxu1 %v3525_v60 }
 0x104   : > { %1215 = vmatprep.subr.bf16.mxu0 %v3530_v61  ;;  %1301 = vmatprep.subr.bf16.mxu1 %v3533_v62 }
 0x107   : > { %1216 = vmatpush1.bf16.msra.mxu0 %v3528_v63  ;;  %1302 = vmatpush1.bf16.msra.mxu1 %v3531_v0 }
 0x108   : > { %1217 = vmatprep.subr.bf16.mxu0 %v3536_v1  ;;  %1303 = vmatprep.subr.bf16.mxu1 %v3539_v2 }
 0x10b   : > { %1218 = vmatpush1.bf16.msra.mxu0 %v3534_v3  ;;  %1304 = vmatpush1.bf16.msra.mxu1 %v3537_v4 }
 0x10c   : > { %1219 = vmatprep.subr.bf16.mxu0 %v3542_v5  ;;  %1305 = vmatprep.subr.bf16.mxu1 %v3545_v6  ;;  %v3576_v5 = vld [vmem:[#allocation8 + $0xa0] ss:$16 sps:$4 sm:$0xff]   ;;  %v3578_v6 = vld [vmem:[#allocation8 + $0xa4] ss:$16 sps:$4 sm:$0xff]  }
 0x10f   : > { %1220 = vmatpush1.bf16.msra.mxu0 %v3540_v7  ;;  %1306 = vmatpush1.bf16.msra.mxu1 %v3543_v8 }
 0x110   : > { %2639 = vmatprep.subr.bf16.mxu0 %v3548_v13  ;;  %2725 = vmatprep.subr.bf16.mxu1 %v3551_v15  ;;  %v3584_v15 = vld [vmem:[#allocation8 + $0xc4] ss:$16 sps:$4 sm:$0xff]  }
 0x112   : > { %1222 = vmatmul.mubr.bf16.vlgmr.msra.gmra.mrb[0].mxu0 %v354_v11  ;;  %1308 = vmatmul.mubr.bf16.vlgmr.msra.gmra.mrb[0].mxu1 %v354_v11  ;;  %v3581_v11 = vld [vmem:[#allocation8 + $0xac] ss:$16 sps:$4 sm:$0xff]  }
 0x113   : > { %2640 = vmatpush1.bf16.msra.mxu0 %v3546_v12  ;;  %2726 = vmatpush1.bf16.msra.mxu1 %v3549_v14  ;;  %v4273_v12 = vadd.s32 8, %v4219_v21 }
 0x114   : > { %2641 = vmatprep.subr.bf16.mxu0 %v3554_v16  ;;  %2727 = vmatprep.subr.bf16.mxu1 %v3557_v17 }
 0x117   : > { %2642 = vmatpush1.bf16.msra.mxu0 %v3552_v18  ;;  %2728 = vmatpush1.bf16.msra.mxu1 %v3555_v19 }
 0x118   : > { %2643 = vmatprep.subr.bf16.mxu0 %v3560_v23  ;;  %2729 = vmatprep.subr.bf16.mxu1 %v3563_v25 }
 0x11b   : > { %2644 = vmatpush1.bf16.msra.mxu0 %v3558_v22  ;;  %2730 = vmatpush1.bf16.msra.mxu1 %v3561_v24  ;;  %v3587_v22 = vld [vmem:[#allocation8 + $0xcc] ss:$16 sps:$4 sm:$0xff]  }
 0x11c   : > { %2645 = vmatprep.subr.bf16.mxu0 %v3566_v31  ;;  %2731 = vmatprep.subr.bf16.mxu1 %v3569_v33  ;;  %v3585_v31 = vld [vmem:[#allocation8 + $0xc8] ss:$16 sps:$4 sm:$0xff]   ;;  %v3590_v33 = vld [vmem:[#allocation8 + $0xe4] ss:$16 sps:$4 sm:$0xff]  }
 0x11f   : > { %2646 = vmatpush1.bf16.msra.mxu0 %v3564_v30  ;;  %2732 = vmatpush1.bf16.msra.mxu1 %v3567_v32  ;;  %v3582_v30 = vld [vmem:[#allocation8 + $0xc0] ss:$16 sps:$4 sm:$0xff]  }
 0x120   : > { %2647 = vmatprep.subr.bf16.mxu0 %v3572_v48  ;;  %2733 = vmatprep.subr.bf16.mxu1 %v3575_v54 }
 0x123   : > { %2648 = vmatpush1.bf16.msra.mxu0 %v3570_v47  ;;  %2734 = vmatpush1.bf16.msra.mxu1 %v3573_v53  ;;  %v3618_v53 = vld [vmem:[#allocation8 + $0x180] ss:$16 sps:$4 sm:$0xff]  }
 0x124   : > { %2649 = vmatprep.subr.bf16.mxu0 %v3578_v6  ;;  %2735 = vmatprep.subr.bf16.mxu1 %v3581_v11  ;;  %v3596_v11 = vld [vmem:[#allocation8 + $0x104] ss:$16 sps:$4 sm:$0xff]   ;;  %v3627_v6 = vld [vmem:[#allocation8 + $0x1a8] ss:$16 sps:$4 sm:$0xff]  }
 0x127   : > { %2650 = vmatpush1.bf16.msra.mxu0 %v3576_v5  ;;  %2736 = vmatpush1.bf16.msra.mxu1 %v3579_v10  ;;  %v3594_v10 = vld [vmem:[#allocation8 + $0x100] ss:$16 sps:$4 sm:$0xff]  }
 0x128   : > { %2651 = vmatprep.subr.bf16.mxu0 %v3584_v15  ;;  %2737 = vmatprep.subr.bf16.mxu1 %v3587_v22  ;;  %v3597_v15 = vld [vmem:[#allocation8 + $0x108] ss:$16 sps:$4 sm:$0xff]  }
 0x12b   : > { %2652 = vmatpush1.bf16.msra.mxu0 %v3582_v30  ;;  %2738 = vmatpush1.bf16.msra.mxu1 %v3585_v31 }
 0x12c   : > { %2653 = vmatprep.subr.bf16.mxu0 %v3590_v33  ;;  %v3600_v33 = vld [vmem:[#allocation8 + $0x120] ss:$16 sps:$4 sm:$0xff]  }
 0x1e5   : > { %v1223_v40 = vpop.f32.mrb[0].mxu0  ;;  %v1309_v41 = vpop.f32.mrb[0].mxu1 }
 0x1e6   : > { %v3238_v42 = vadd.f32 %v1223_v40, %v489_v34  ;;  %v3242_v43 = vadd.f32 %v1309_v41, %v497_v36  ;;  %v1225_v45 = vpop.f32.mrb[1].mxu0  ;;  %v1311_v46 = vpop.f32.mrb[1].mxu1  ;;  %v1335_v40 = vand.u32 7, %v4273_v12 }
 0x1e7   : > { %v3239_v49 = vadd.f32 %v1225_v45, %v493_v38  ;;  %v1227_v51 = vpop.f32.mrb[2].mxu0  ;;  %v1313_v52 = vpop.f32.mrb[2].mxu1  ;;  %v3243_v2 = vadd.f32 %v1311_v46, %v501_v50  ;;  %v3588_v45 = vld [vmem:[#allocation8 + $0xe0] ss:$16 sps:$4 sm:$0xff]  }
 0x1e8   : > { %v4247_v55 = vmax.f32 %v3238_v42, 0.0  ;;  %v4249_v56 = vmax.f32 %v3242_v43, 0.0  ;;  %v3240_v57 = vadd.f32 %v1227_v51, %v489_v34  ;;  %v3244_v58 = vadd.f32 %v1313_v52, %v497_v36  ;;  %v1229_v59 = vpop.f32.mrb[3].mxu0  ;;  %v1315_v60 = vpop.f32.mrb[3].mxu1  ;;  %v3593_v36 = vld [vmem:[#allocation8 + $0xec] ss:$16 sps:$4 sm:$0xff]   ;;  %2654 = vmatpush1.bf16.msra.mxu0 %v3588_v45 }
 0x1e9   : > { %v3241_v61 = vadd.f32 %v1229_v59, %v493_v38  ;;  %v4254_v63 = vmax.f32 %v3239_v49, 0.0  ;;  %v3245_v4 = vadd.f32 %v1315_v60, %v501_v50  ;;  %v4287_v23 = vmax.f32 %v3243_v2, 0.0  ;;  %v3591_v52 = vld [vmem:[#allocation8 + $0xe8] ss:$16 sps:$4 sm:$0xff]   ;;  %2739 = vmatprep.subr.bf16.mxu1 %v3593_v36  ;;  %2655 = vmatprep.subr.bf16.mxu0 %v3596_v11  ;;  %v3602_v36 = vld [vmem:[#allocation8 + $0x124] ss:$16 sps:$4 sm:$0xff]  }
 0x1ea   : > { %v4252_v62 = vmul.f32 %v1585_v44, %v4249_v56  ;;  %v4256_v0 = vmax.f32 %v3240_v57, 0.0  ;;  %v4258_v1 = vmax.f32 %v3244_v58, 0.0  ;;  %1510 = vrot.lane.b32.xlu0 %v4247_v55, %s3944_s13  ;;  %v1356_v8 = vrot.slane %v4247_v55, 7  ;;  %2740 = vmatpush1.bf16.msra.mxu1 %v3591_v52  ;;  %v3615_v52 = vld [vmem:[#allocation8 + $0x168] ss:$16 sps:$4 sm:$0xff]  }
 0x1eb   : > { %v4262_v3 = vmax.f32 %v3241_v61, 0.0  ;;  %v1358_v13 = vrot.slane %v4249_v56, 7  ;;  %v1357_v18 = vrot.slane %v4254_v63, 7  ;;  %v4289_v24 = vmax.f32 %v3245_v4, 0.0  ;;  %v3623_v58 = vld [vmem:[#allocation8 + $0x18c] ss:$16 sps:$4 sm:$0xff]  }
 0x1ec   : > { %v4266_v7 = vmul.f32 %v1585_v44, %v4258_v1  ;;  %1512 = vrot.lane.b32.xlu1 %v4256_v0, %s3944_s13  ;;  %v1360_v9 = vrot.slane %v4256_v0, 7  ;;  %v1362_v14 = vrot.slane %v4258_v1, 7  ;;  %v1334_v38 = vand.u32 7, %v4219_v21  ;;  %2656 = vmatpush1.bf16.msra.mxu0 %v3594_v10  ;;  %v3624_v10 = vld [vmem:[#allocation8 + $0x1a0] ss:$16 sps:$4 sm:$0xff]  }
 0x1ed   : > { %v1361_v19 = vrot.slane %v4262_v3, 7  ;;  %v1359_v41 = vrot.slane %v4287_v23, 7  ;;  %v1363_v42 = vrot.slane %v4289_v24, 7  ;;  %v1646_v43 = vrot.slane %v4247_v55, 1  ;;  %2657 = vmatprep.subr.bf16.mxu0 %v3602_v36  ;;  %v3626_v11 = vld [vmem:[#allocation8 + $0x1a4] ss:$16 sps:$4 sm:$0xff]  }
 0x1ee   : > { %4963 = vst [vmem:[#allocation20_spill] sm:$0xff] %v4266_v7  ;;  %1518 = vrot.lane.b32.xlu0 %v4249_v56, %s3944_s13  ;;  %v1369_v16 = vsel %vm1364_vm0, %v1360_v9, %v1356_v8  ;;  %v4283_v17 = vsel %vm1364_vm0, %v1356_v8, %v1360_v9  ;;  %v1367_v25 = vsel %vm1364_vm0, %v1358_v13, %v1362_v14  ;;  %v1650_v44 = vrot.slane %v4256_v0, 1  ;;  %v3632_v9 = vld [vmem:[#allocation8 + $0x1c4] ss:$16 sps:$4 sm:$0xff]   ;;  %v4493_v36 = vld [vmem:[#allocation7 + $0x8] sm:$0xff] }
 0x1ef   : > { %v4295_v28 = vsel %vm1364_vm0, %v1362_v14, %v1358_v13  ;;  %v1370_v32 = vsel %vm1364_vm0, %v1361_v19, %v1357_v18  ;;  %v4303_v34 = vsel %vm1364_vm0, %v1357_v18, %v1361_v19  ;;  %v1651_v46 = vrot.slane %v4262_v3, 1 }
 0x1f0   : > { %1520 = vrot.lane.b32.xlu1 %v4258_v1, %s3944_s13  ;;  %v1653_v47 = vrot.slane %v4289_v24, 1  ;;  %v1372_v48 = vsel %vm1364_vm0, %v1363_v42, %v1359_v41  ;;  %v4322_v49 = vsel %vm1364_vm0, %v1359_v41, %v1363_v42  ;;  %v4326_v50 = vsel %vm1654_vm1, %v1646_v43, %v1650_v44  ;;  %v3608_v41 = vld [vmem:[#allocation8 + $0x144] ss:$16 sps:$4 sm:$0xff]   ;;  %2658 = vmatpush1.bf16.msra.mxu0 %v3600_v33  ;;  %v3606_v42 = vld [vmem:[#allocation8 + $0x140] ss:$16 sps:$4 sm:$0xff]  }
 0x1f1   : > { %v4330_v51 = vsel %vm1654_vm1, %v1650_v44, %v1646_v43  ;;  %vm4334_vm2 = vcmp.ne.s32.totalorder %v1334_v38, 0  ;;  %v1647_v54 = vrot.slane %v4254_v63, 1  ;;  %v1649_v57 = vrot.slane %v4287_v23, 1  ;;  %v3609_v43 = vld [vmem:[#allocation8 + $0x148] ss:$16 sps:$4 sm:$0xff]   ;;  %2659 = vmatprep.subr.bf16.mxu0 %v3608_v41  ;;  %v4491_v33 = vld [vmem:[#allocation7] sm:$0xff] }
 0x1f2   : > { %1514 = vrot.lane.b32.xlu0 %v4254_v63, %s3944_s13  ;;  %vm4340_vm3 = vcmp.ne.s32.totalorder %v1335_v40, 0  ;;  %v4345_v59 = vsub.s32 7, %v4219_v21  ;;  %v4367_v5 = vsel %vm4334_vm2, %v1369_v16, 0.0  ;;  %vm4369_vm4 = vcmp.ne.s32.totalorder %v1334_v38, 7  ;;  %v3599_v16 = vld [vmem:[#allocation8 + $0x10c] ss:$16 sps:$4 sm:$0xff]  }
 0x1f3   : > { %v4351_v60 = vsel %vm1654_vm1, %v1647_v54, %v1651_v46  ;;  %v4355_v61 = vsel %vm1654_vm1, %v1651_v46, %v1647_v54  ;;  %v4359_v2 = vsel %vm1654_vm1, %v1649_v57, %v1653_v47  ;;  %v4363_v4 = vsel %vm1654_vm1, %v1653_v47, %v1649_v57  ;;  %2741 = vmatprep.subr.bf16.mxu1 %v3599_v16  ;;  %v3603_v38 = vld [vmem:[#allocation8 + $0x128] ss:$16 sps:$4 sm:$0xff]   ;;  %v3611_v44 = vld [vmem:[#allocation8 + $0x14c] ss:$16 sps:$4 sm:$0xff]   ;;  %v3620_v54 = vld [vmem:[#allocation8 + $0x184] ss:$16 sps:$4 sm:$0xff]  }
 0x1f4   : > { %1516 = vrot.lane.b32.xlu1 %v4262_v3, %s3944_s13  ;;  %v4377_v8 = vsel %vm4340_vm3, %v1367_v25, 0.0  ;;  %vm4379_vm5 = vcmp.ne.s32.totalorder %v1335_v40, 7  ;;  %v1648_v12 = vrot.slane %v4249_v56, 1  ;;  %v1652_v13 = vrot.slane %v4258_v1, 1  ;;  %2742 = vmatpush1.bf16.msra.mxu1 %v3597_v15  ;;  %v3617_v46 = vld [vmem:[#allocation8 + $0x16c] ss:$16 sps:$4 sm:$0xff]  }
 0x1f5   : > { %v1746_v14 = vrot.slane %v4238_v37, %v4345_v59  ;;  %v4392_v18 = vsel %vm4340_vm3, %v4283_v17, 0.0  ;;  %v4408_v17 = vsel %vm4334_vm2, %v1370_v32, 0.0  ;;  %v4420_v31 = vsel %vm4334_vm2, %v4295_v28, 0.0  ;;  %v3605_v32 = vld [vmem:[#allocation8 + $0x12c] ss:$16 sps:$4 sm:$0xff]   ;;  %2660 = vmatpush1.bf16.msra.mxu0 %v3606_v42 }
 0x1f6   : > { %1522 = vrot.lane.b32.xlu0 %v4287_v23, %s3944_s13  ;;  %v1657_v19 = vsel %vm1654_vm1, %v1648_v12, %v1652_v13  ;;  %v1661_v56 = vsel %vm1654_vm1, %v1652_v13, %v1648_v12  ;;  %v4427_v40 = vsel %vm4340_vm3, %v4303_v34, 0.0  ;;  %v4433_v28 = vsel %vm4334_vm2, %v1372_v48, 0.0  ;;  %2743 = vmatprep.subr.bf16.mxu1 %v3605_v32  ;;  %v3614_v34 = vld [vmem:[#allocation8 + $0x164] ss:$16 sps:$4 sm:$0xff]   ;;  %v3612_v48 = vld [vmem:[#allocation8 + $0x160] ss:$16 sps:$4 sm:$0xff]  }
 0x1f7   : > { %v1665_v1 = vsel %vm4369_vm4, %v1657_v19, 0.0  ;;  %v4404_v22 = vsel %vm4379_vm5, %v1661_v56, 0.0  ;;  %v4440_v45 = vsel %vm4340_vm3, %v4322_v49, 0.0  ;;  %v4447_v47 = vsel %vm4369_vm4, %v4326_v50, 0.0  ;;  %2661 = vmatprep.subr.bf16.mxu0 %v3614_v34  ;;  %v3621_v57 = vld [vmem:[#allocation8 + $0x188] ss:$16 sps:$4 sm:$0xff]  }
 0x1f8   : > { %1524 = vrot.lane.b32.xlu1 %v4289_v24, %s3944_s13  ;;  %v4410_v25 = vmul.f32 %v1746_v14, %v1665_v1  ;;  %v4413_v30 = vmul.f32 %v1746_v14, %v4404_v22  ;;  %2744 = vmatpush1.bf16.msra.mxu1 %v3603_v38  ;;  %v4454_v49 = vsel %vm4379_vm5, %v4330_v51, 0.0  ;;  %v4461_v50 = vsel %vm4369_vm4, %v4351_v60, 0.0  ;;  %v3630_v12 = vld [vmem:[#allocation8 + $0x1c0] ss:$16 sps:$4 sm:$0xff]   ;;  %v3635_v13 = vld [vmem:[#allocation8 + $0x1cc] ss:$16 sps:$4 sm:$0xff]  }
 0x1f9   : > { %2745 = vmatprep.subr.bf16.mxu1 %v3611_v44  ;;  %2662 = vmatpush1.bf16.msra.mxu0 %v3612_v48  ;;  %v4468_v51 = vsel %vm4379_vm5, %v4355_v61, 0.0  ;;  %v4475_v60 = vsel %vm4369_vm4, %v4359_v2, 0.0  ;;  %v4482_v61 = vsel %vm4379_vm5, %v4363_v4, 0.0  ;;  %v3629_v2 = vld [vmem:[#allocation8 + $0x1ac] ss:$16 sps:$4 sm:$0xff]   ;;  %v4500_v41 = vand.u32 127, %v486_v20 }
 0x1fa   : > { %1381 = vrot.lane.b32.xlu0 %v4367_v5, %s3944_s13  ;;  %4972 = vst [vmem:[#allocation21_spill] sm:$0xff] %v4410_v25  ;;  %4973 = vst [vmem:[#allocation22_spill] sm:$0xff] %v4413_v30  ;;  %2663 = vmatprep.subr.bf16.mxu0 %v3620_v54  ;;  %v3633_v4 = vld [vmem:[#allocation8 + $0x1c8] ss:$16 sps:$4 sm:$0xff]   ;;  %v3638_v14 = vld [vmem:[#allocation8 + $0x1e4] ss:$16 sps:$4 sm:$0xff]   ;;  %v1581_v44 = vrot.slane %v4493_v36, %v4235_v35  ;;  %v1441_v48 = vrot.slane %v4491_v33, %v4231_v29 }
 0x1fb   : > { %v3641_v15 = vld [vmem:[#allocation8 + $0x1ec] ss:$16 sps:$4 sm:$0xff]   ;;  %v3636_v16 = vld [vmem:[#allocation8 + $0x1e0] ss:$16 sps:$4 sm:$0xff]   ;;  %v3639_v19 = vld [vmem:[#allocation8 + $0x1e8] ss:$16 sps:$4 sm:$0xff]   ;;  %v1445_v20 = vrot.slane %v4493_v36, %v4231_v29  ;;  %v1738_v54 = vrot.slane %v4491_v33, %v4345_v59 }
 0x1fc   : > { %1391 = vrot.lane.b32.xlu1 %v4377_v8, %s3944_s13  ;;  %2746 = vmatpush1.bf16.msra.mxu1 %v3609_v43  ;;  %v3644_v56 = vld [vmem:[#allocation8 + $0x204] ss:$16 sps:$4 sm:$0xff]   ;;  %v4495_v38 = vld [vmem:[#allocation7 + $0x18] sm:$0xff]  ;;  %v1616_v42 = vsub.s32 5, %v4219_v21  ;;  %v1577_v43 = vrot.slane %v4491_v33, %v4235_v35  ;;  %vm1397_vm6 = vcmp.lt.s32.totalorder %v4500_v41, 64  ;;  %vm1340_vm7 = vcmp.ge.s32.totalorder %v4500_v41, 64 }
 0x1fd   : > { %2747 = vmatprep.subr.bf16.mxu1 %v3617_v46  ;;  %2664 = vmatpush1.bf16.msra.mxu0 %v3618_v53  ;;  %v1589_v34 = vrot.slane %v4495_v38, %v4235_v35  ;;  %v1453_v53 = vrot.slane %v4495_v38, %v4231_v29  ;;  %v1750_v35 = vrot.slane %v4495_v38, %v4345_v59 }
 0x1fe   : > { %1383 = vrot.lane.b32.xlu0 %v4392_v18, %s3944_s13  ;;  %2665 = vmatprep.subr.bf16.mxu0 %v3626_v11  ;;  %v4530_v11 = vrot.slane %v4238_v37, %v4242_v39 }
 0x200   : > { %1385 = vrot.lane.b32.xlu1 %v4408_v17, %s3944_s13  ;;  %2748 = vmatpush1.bf16.msra.mxu1 %v3615_v52  ;;  %v1449_v52 = vrot.slane %v4238_v37, %v4231_v29 }
 0x201   : > { %2749 = vmatprep.subr.bf16.mxu1 %v3623_v58  ;;  %2666 = vmatpush1.bf16.msra.mxu0 %v3624_v10  ;;  %v4525_v10 = vrot.slane %v4493_v36, %v4242_v39 }
 0x202   : > { %1389 = vrot.lane.b32.xlu0 %v4420_v31, %s3944_s13  ;;  %2667 = vmatprep.subr.bf16.mxu0 %v3632_v9  ;;  %v4545_v9 = vmul.f32 %v1589_v34, %v4287_v23  ;;  %v4566_v23 = vmul.f32 %v1445_v20, %v4408_v17  ;;  %v4585_v17 = vmul.f32 %v1738_v54, %v4447_v47 }
 0x204   : > { %1387 = vrot.lane.b32.xlu1 %v4427_v40, %s3944_s13  ;;  %2750 = vmatpush1.bf16.msra.mxu1 %v3621_v57  ;;  %v1742_v57 = vrot.slane %v4493_v36, %v4345_v59  ;;  %v4542_v59 = vmul.f32 %v1581_v44, %v4254_v63  ;;  %v4563_v63 = vmul.f32 %v1449_v52, %v4377_v8  ;;  %v4582_v8 = vadd.s32 384, %v4500_v41 }
 0x205   : > { %2751 = vmatprep.subr.bf16.mxu1 %v3629_v2  ;;  %2668 = vmatpush1.bf16.msra.mxu0 %v3630_v12  ;;  %v4536_v2 = vrot.slane %v4493_v36, %v1616_v42  ;;  %v4539_v12 = vmul.f32 %v1577_v43, %v4247_v55  ;;  %v4560_v55 = vmul.f32 %v1441_v48, %v4392_v18 }
 0x206   : > { %1393 = vrot.lane.b32.xlu0 %v4433_v28, %s3944_s13  ;;  %2669 = vmatprep.subr.bf16.mxu0 %v3638_v14  ;;  %v4551_v14 = vmul.f32 %v1581_v44, %v4262_v3  ;;  %v4579_v18 = vmul.f32 %v1453_v53, %v4440_v45  ;;  %4975 = vst [vmem:[#allocation24_spill] sm:$0xff] %v4585_v17  ;;  %vm1347_vm8 = vcmp.lt.s32.totalorder %v4582_v8, 448  ;;  %v4990_v8 = vld [vmem:[#allocation20_spill] sm:$0xff] }
 0x208   : > { %1395 = vrot.lane.b32.xlu1 %v4440_v45, %s3944_s13  ;;  %2752 = vmatpush1.bf16.msra.mxu1 %v3627_v6  ;;  %v4533_v6 = vrot.slane %v4491_v33, %v1616_v42  ;;  %v4600_v45 = vmul.f32 %v1750_v35, %v4482_v61 }
 0x209   : > { %2753 = vmatprep.subr.bf16.mxu1 %v3635_v13  ;;  %2670 = vmatpush1.bf16.msra.mxu0 %v3636_v16  ;;  %v4557_v16 = vmul.f32 %v1441_v48, %v4367_v5  ;;  %v4576_v5 = vmul.f32 %v1453_v53, %v4433_v28  ;;  %v1485_v53 = vrot.slane %v4493_v36, %v4225_v27 }
 0x20a   : > { %1671 = vrot.lane.b32.xlu0 %v4447_v47, %s3944_s13  ;;  %2682 = vmatprep.subr.bf16.mxu0 %v3644_v56  ;;  %v4591_v56 = vmul.f32 %v1742_v57, %v4461_v50  ;;  %4979 = vst [vmem:[#allocation28_spill] sm:$0xff] %v4600_v45 }
 0x20c   : > { %1673 = vrot.lane.b32.xlu1 %v4454_v49, %s3944_s13  ;;  %2754 = vmatpush1.bf16.msra.mxu1 %v3633_v4  ;;  %v4548_v4 = vmul.f32 %v1577_v43, %v4256_v0  ;;  %v4569_v0 = vmul.f32 %v1449_v52, %v4420_v31  ;;  %v4588_v31 = vmul.f32 %v1738_v54, %v4454_v49 }
 0x20d   : > { %2755 = vmatprep.subr.bf16.mxu1 %v3641_v15  ;;  %v4554_v15 = vmul.f32 %v1589_v34, %v4289_v24  ;;  %v4573_v24 = vmul.f32 %v1445_v20, %v4427_v40  ;;  %v4594_v40 = vmul.f32 %v1742_v57, %v4468_v51  ;;  %v1545_v49 = vrot.slane %v4491_v33, %v4242_v39 }
 0x20e   : > { %1675 = vrot.lane.b32.xlu0 %v4461_v50, %s3944_s13  ;;  %4976 = vst [vmem:[#allocation25_spill] sm:$0xff] %v4588_v31  ;;  %v1557_v50 = vrot.slane %v4495_v38, %v4242_v39  ;;  %v1421_v34 = vrot.slane %v4493_v36, %v4222_v26  ;;  %v1481_v20 = vrot.slane %v4491_v33, %v4225_v27 }
 0x20f   : > { %4974 = vst [vmem:[#allocation23_spill] sm:$0xff] %v4554_v15  ;;  %4977 = vst [vmem:[#allocation26_spill] sm:$0xff] %v4594_v40  ;;  %v4634_v54 = vrot.slane %v4495_v38, %v4222_v26  ;;  %v4638_v57 = vrot.slane %v4238_v37, %v4225_v27 }
 0x210   : > { %1677 = vrot.lane.b32.xlu1 %v4468_v51, %s3944_s13  ;;  %2756 = vmatpush1.bf16.msra.mxu1 %v3639_v19  ;;  %v1625_v19 = vrot.slane %v4238_v37, %v1616_v42 }
 0x212   : > { %1683 = vrot.lane.b32.xlu0 %v4475_v60, %s3944_s13 }
 0x214   : > { %1685 = vrot.lane.b32.xlu1 %v4482_v61, %s3944_s13  ;;  %v1629_v61 = vrot.slane %v4495_v38, %v1616_v42  ;;  %v4630_v42 = vrot.slane %v4491_v33, %v4222_v26 }
 0x216   : > { %1679 = vrot.lane.b32.xlu0 %v1665_v1, %s3944_s13  ;;  %v3647_v1 = vld [vmem:[#allocation8 + $0x20c] ss:$16 sps:$4 sm:$0xff]  }
 0x217   : > { %2768 = vmatprep.subr.bf16.mxu1 %v3647_v1  ;;  %v4597_v1 = vmul.f32 %v1750_v35, %v4475_v60  ;;  %v1705_v60 = vsub.s32 6, %v4219_v21  ;;  %v1425_v21 = vrot.slane %v4238_v37, %v4222_v26  ;;  %v4642_v35 = vrot.slane %v4495_v38, %v4225_v27 }
 0x218   : > { %1681 = vrot.lane.b32.xlu1 %v4404_v22, %s3944_s13 }
 0x219   : > { %4978 = vst [vmem:[#allocation27_spill] sm:$0xff] %v4597_v1  ;;  %v4655_v25 = vrot.slane %v4493_v36, %v1705_v60  ;;  %v4658_v1 = vrot.slane %v4491_v33, %v1705_v60  ;;  %v4664_v31 = vrot.slane %v4238_v37, %v1705_v60 }
 0x21b   : > { %4981 = vst [vmem:[#allocation30_spill] sm:$0xff] %v4664_v31 }
 0x25c   : > { %v4489_v22 = vpop.permute.xlu0 %1510 }
 0x25e   : > { %v4497_v32 = vpop.permute.xlu1 %1512 }
 0x260   : > { %v1519_v46 = vpop.permute.xlu0 %1518 }
 0x262   : > { %v1521_v58 = vpop.permute.xlu1 %1520 }
 0x264   : > { %v1515_v13 = vpop.permute.xlu0 %1514 }
 0x265   : > { %v1528_v30 = vsel %vm1397_vm6, %v1515_v13, %v1519_v46  ;;  %v1530_v45 = vsel %vm1397_vm6, %v4489_v22, %v1515_v13 }
 0x266   : > { %v1517_v3 = vpop.permute.xlu1 %1516 }
 0x267   : > { %v1529_v36 = vsel %vm1397_vm6, %v1517_v3, %v1521_v58  ;;  %v1531_v33 = vsel %vm1397_vm6, %v4497_v32, %v1517_v3  ;;  %v4694_v3 = vmul.f32 %v4533_v6, %v1530_v45 }
 0x268   : > { %v1523_v28 = vpop.permute.xlu0 %1522 }
 0x269   : > { %v1526_v47 = vsel %vm1397_vm6, %v1519_v46, %v1523_v28  ;;  %v4667_v46 = vrot.slane %v4495_v38, %v1705_v60  ;;  %v4685_v38 = vmul.f32 %v4530_v11, %v1528_v30  ;;  %v4697_v60 = vmul.f32 %v4536_v2, %v1528_v30 }
 0x26a   : > { %v4609_v51 = vmul.f32 %v1625_v19, %v1526_v47  ;;  %v1525_v43 = vpop.permute.xlu1 %1524 }
 0x26b   : > { %v1527_v44 = vsel %vm1397_vm6, %v1521_v58, %v1525_v43  ;;  %4982 = vst [vmem:[#allocation31_spill] sm:$0xff] %v4667_v46  ;;  %v1533_v58 = vsel %vm1397_vm6, %v1525_v43, %v4497_v32  ;;  %v4705_v32 = vmul.f32 %v4530_v11, %v1529_v36  ;;  %v4708_v43 = vmul.f32 %v4533_v6, %v1531_v33 }
 0x26c   : > { %v4618_v48 = vmul.f32 %v1625_v19, %v1527_v44  ;;  %v4620_v52 = vpop.permute.xlu0 %1381  ;;  %v1807_v19 = vld [vmem:[%s4920_s4] sm:$0xf] }
 0x26d   : > { %v4670_v13 = vrot.slane %v1807_v19, %v4225_v27  ;;  %v4678_v7 = vrot.slane %v1807_v19, %v4231_v29  ;;  %v4681_v37 = vrot.slane %v1807_v19, %v4222_v26 }
 0x26e   : > { %4980 = vst [vmem:[#allocation29_spill] sm:$0xff] %v4618_v48  ;;  %v4652_v40 = vpop.permute.xlu1 %1391  ;;  %v1532_v48 = vsel %vm1397_vm6, %v1523_v28, %v4489_v22  ;;  %v1559_v22 = vmul.f32 %v4525_v10, %v1530_v45  ;;  %v4691_v28 = vrot.slane %v1807_v19, %v4242_v39  ;;  %v4714_v45 = vmul.f32 %v4536_v2, %v1529_v36 }
 0x26f   : > { %4983 = vst [vmem:[#allocation32_spill] sm:$0xff] %v4670_v13  ;;  %4984 = vst [vmem:[#allocation33_spill] sm:$0xff] %v4678_v7  ;;  %v1534_v29 = vsel %vm1340_vm7, %v1532_v48, 0.0  ;;  %v1609_v27 = vsel %vm1347_vm8, %v1532_v48, 0.0  ;;  %v1563_v13 = vmul.f32 %v4525_v10, %v1531_v33  ;;  %v1538_v19 = vsel %vm1340_vm7, %v1533_v58, 0.0 }
 0x270   : > { %v1384_v15 = vpop.permute.xlu0 %1383  ;;  %4985 = vst [vmem:[#allocation34_spill] sm:$0xff] %v4681_v37  ;;  %4986 = vst [vmem:[#allocation35_spill] sm:$0xff] %v4691_v28  ;;  %v1613_v48 = vsel %vm1347_vm8, %v1533_v58, 0.0  ;;  %v1558_v11 = vmul.f32 %v1545_v49, %v1534_v29  ;;  %v1561_v28 = vmul.f32 %v1557_v50, %v1526_v47  ;;  %v4720_v7 = vmul.f32 %v1629_v61, %v1609_v27 }
 0x271   : > { %v4724_v33 = vmul.f32 %v1557_v50, %v1527_v44  ;;  %v1562_v46 = vmul.f32 %v1545_v49, %v1538_v19  ;;  %v4727_v17 = vmul.f32 %v1629_v61, %v1613_v48 }
 0x272   : > { %v1386_v26 = vpop.permute.xlu1 %1385 }
 0x273   : > { %v1402_v30 = vsel %vm1397_vm6, %v4620_v52, %v1386_v26 }
 0x274   : > { %v1431_v10 = vmul.f32 %v1421_v34, %v1402_v30  ;;  %v1390_v39 = vpop.permute.xlu0 %1389  ;;  %v1494_v47 = vmul.f32 %v1481_v20, %v1402_v30 }
 0x275   : > { %v1400_v6 = vsel %vm1397_vm6, %v1386_v26, %v1390_v39 }
 0x276   : > { %v1463_v2 = vadd.f32 %v4566_v23, %v1431_v10  ;;  %v1432_v36 = vmul.f32 %v1425_v21, %v1400_v6  ;;  %v1495_v37 = vmul.f32 %v1485_v53, %v1400_v6  ;;  %v1388_v31 = vpop.permute.xlu1 %1387 }
 0x277   : > { %v1401_v29 = vsel %vm1397_vm6, %v1388_v31, %v4652_v40  ;;  %v1403_v27 = vsel %vm1397_vm6, %v1384_v15, %v1388_v31 }
 0x278   : > { %v1464_v26 = vadd.f32 %v4569_v0, %v1432_v36  ;;  %v1503_v50 = vadd.f32 %v1495_v37, %v1463_v2  ;;  %v1435_v44 = vmul.f32 %v1421_v34, %v1403_v27  ;;  %v1394_v58 = vpop.permute.xlu0 %1393  ;;  %v1436_v23 = vmul.f32 %v1425_v21, %v1401_v29 }
 0x279   : > { %v1498_v10 = vmul.f32 %v1481_v20, %v1403_v27  ;;  %v1398_v49 = vsel %vm1397_vm6, %v1390_v39, %v1394_v58  ;;  %v1404_v61 = vsel %vm1397_vm6, %v1394_v58, %v4620_v52  ;;  %v1499_v6 = vmul.f32 %v1485_v53, %v1401_v29 }
 0x27a   : > { %v1567_v19 = vadd.f32 %v1559_v22, %v1503_v50  ;;  %v1467_v48 = vadd.f32 %v4573_v24, %v1435_v44  ;;  %v1406_v31 = vsel %vm1340_vm7, %v1404_v61, 0.0  ;;  %v1396_v0 = vpop.permute.xlu1 %1395  ;;  %v1433_v21 = vmul.f32 %v4634_v54, %v1398_v49 }
 0x27b   : > { %v1430_v34 = vmul.f32 %v4630_v42, %v1406_v31  ;;  %v1473_v20 = vsel %vm1347_vm8, %v1404_v61, 0.0  ;;  %v1496_v39 = vmul.f32 %v4638_v57, %v1398_v49  ;;  %v1399_v24 = vsel %vm1397_vm6, %v4652_v40, %v1396_v0  ;;  %v3096_v31 = vld [vmem:[#allocation7 + $0x20] ss:$0 sm:$0xff] }
 0x27c   : > { %v1507_v37 = vadd.f32 %v1499_v6, %v1467_v48  ;;  %v1497_v52 = vmul.f32 %v4642_v35, %v1473_v20  ;;  %v1405_v53 = vsel %vm1397_vm6, %v1396_v0, %v1384_v15  ;;  %v1672_v22 = vpop.permute.xlu0 %1671  ;;  %v1465_v2 = vadd.f32 %v4576_v5, %v1433_v21 }
 0x27d   : > { %v1462_v30 = vadd.f32 %v4557_v16, %v1430_v34  ;;  %v1504_v36 = vadd.f32 %v1496_v39, %v1464_v26  ;;  %v1410_v29 = vsel %vm1340_vm7, %v1405_v53, 0.0  ;;  %v1468_v27 = vadd.f32 %v4563_v63, %v1436_v23 }
 0x27e   : > { %v1434_v50 = vmul.f32 %v4630_v42, %v1410_v29  ;;  %v1437_v44 = vmul.f32 %v4634_v54, %v1399_v24  ;;  %v1477_v40 = vsel %vm1347_vm8, %v1405_v53, 0.0  ;;  %v1674_v58 = vpop.permute.xlu1 %1673  ;;  %v1571_v15 = vadd.f32 %v1563_v13, %v1507_v37  ;;  %v3099_v37 = vld [vmem:[#allocation7 + $0x38] ss:$0 sm:$0xff] }
 0x27f   : > { %v1502_v49 = vadd.f32 %v1494_v47, %v1462_v30  ;;  %v1505_v61 = vadd.f32 %v1497_v52, %v1465_v2  ;;  %v1500_v16 = vmul.f32 %v4638_v57, %v1399_v24  ;;  %v1501_v48 = vmul.f32 %v4642_v35, %v1477_v40  ;;  %v3098_v2 = vld [vmem:[#allocation7 + $0x30] ss:$0 sm:$0xff] }
 0x280   : > { %v1466_v5 = vadd.f32 %v4560_v55, %v1434_v50  ;;  %v1469_v26 = vadd.f32 %v4579_v18, %v1437_v44  ;;  %v1599_v63 = vadd.f32 %v4542_v59, %v1567_v19  ;;  %v1676_v42 = vpop.permute.xlu0 %1675  ;;  %v1568_v54 = vadd.f32 %v4685_v38, %v1504_v36  ;;  %v3097_v44 = vld [vmem:[#allocation7 + $0x28] ss:$0 sm:$0xff] }
 0x281   : > { %v1566_v23 = vadd.f32 %v1558_v11, %v1502_v49  ;;  %v1508_v6 = vadd.f32 %v1500_v16, %v1468_v27  ;;  %v1691_v13 = vsel %vm1397_vm6, %v1672_v22, %v1676_v42  ;;  %v1569_v47 = vadd.f32 %v1561_v28, %v1505_v61  ;;  %v4987_v49 = vld [vmem:[#allocation24_spill] sm:$0xff]  ;;  %v4988_v16 = vld [vmem:[#allocation31_spill] sm:$0xff] }
 0x282   : > { %v1506_v0 = vadd.f32 %v1498_v10, %v1466_v5  ;;  %v1509_v57 = vadd.f32 %v1501_v48, %v1469_v26  ;;  %v1720_v55 = vmul.f32 %v4655_v25, %v1691_v13  ;;  %v1678_v34 = vpop.permute.xlu1 %1677  ;;  %v1639_v35 = vadd.f32 %v4697_v60, %v1599_v63  ;;  %v4989_v48 = vld [vmem:[#allocation30_spill] sm:$0xff] }
 0x283   : > { %v1572_v18 = vadd.f32 %v4705_v32, %v1508_v6  ;;  %v1603_v59 = vadd.f32 %v4551_v14, %v1571_v15  ;;  %v1692_v38 = vsel %vm1397_vm6, %v1674_v58, %v1678_v34  ;;  %v1791_v21 = vmul.f32 %v3096_v31, %v1691_v13  ;;  %v4991_v6 = vld [vmem:[#allocation23_spill] sm:$0xff] }
 0x284   : > { %v1570_v11 = vadd.f32 %v1562_v46, %v1506_v0  ;;  %v1573_v19 = vadd.f32 %v4724_v33, %v1509_v57  ;;  %v1724_v28 = vmul.f32 %v4655_v25, %v1692_v38  ;;  %v1684_v10 = vpop.permute.xlu0 %1683  ;;  %v1728_v20 = vadd.f32 %v1720_v55, %v1639_v35  ;;  %v4993_v55 = vld [vmem:[#allocation29_spill] sm:$0xff] }
 0x285   : > { %v1643_v39 = vadd.f32 %v4714_v45, %v1603_v59  ;;  %v1598_v32 = vadd.f32 %v4539_v12, %v1566_v23  ;;  %v1693_v60 = vsel %vm1397_vm6, %v1684_v10, %v1672_v22  ;;  %v1600_v25 = vadd.f32 %v4252_v62, %v1568_v54  ;;  %v4994_v59 = vld [vmem:[#allocation27_spill] sm:$0xff] }
 0x286   : > { %v1695_v14 = vsel %vm1340_vm7, %v1693_v60, 0.0  ;;  %v1770_v46 = vsel %vm1347_vm8, %v1693_v60, 0.0  ;;  %v1686_v33 = vpop.permute.xlu1 %1685  ;;  %v1602_v52 = vadd.f32 %v4548_v4, %v1570_v11  ;;  %v1795_v53 = vmul.f32 %v3096_v31, %v1692_v38 }
 0x287   : > { %v1732_v24 = vadd.f32 %v1724_v28, %v1643_v39  ;;  %v1638_v45 = vadd.f32 %v4694_v3, %v1598_v32  ;;  %v1719_v12 = vmul.f32 %v4658_v1, %v1695_v14  ;;  %v1794_v30 = vmul.f32 %v3099_v37, %v1770_v46  ;;  %v4996_v39 = vld [vmem:[#allocation26_spill] sm:$0xff] }
 0x288   : > { %v1694_v22 = vsel %vm1397_vm6, %v1686_v33, %v1674_v58  ;;  %v1601_v36 = vadd.f32 %v4545_v9, %v1569_v47  ;;  %v1640_v29 = vadd.f32 %v4609_v51, %v1600_v25  ;;  %v1680_v27 = vpop.permute.xlu0 %1679  ;;  %v1642_v4 = vadd.f32 %v4708_v43, %v1602_v52  ;;  %v4992_v47 = vld [vmem:[#allocation25_spill] sm:$0xff] }
 0x289   : > { %v1727_v50 = vadd.f32 %v1719_v12, %v1638_v45  ;;  %v1699_v62 = vsel %vm1340_vm7, %v1694_v22, 0.0  ;;  %v1760_v3 = vadd.f32 %v4591_v56, %v1728_v20  ;;  %v1774_v58 = vsel %vm1347_vm8, %v1694_v22, 0.0  ;;  %v4997_v45 = vld [vmem:[#allocation34_spill] sm:$0xff] }
 0x28a   : > { %v1723_v40 = vmul.f32 %v4658_v1, %v1699_v62  ;;  %v1641_v15 = vadd.f32 %v4720_v7, %v1601_v36  ;;  %v1687_v9 = vsel %vm1397_vm6, %v1680_v27, %v1684_v10  ;;  %v1682_v51 = vpop.permute.xlu1 %1681  ;;  %v1689_v43 = vsel %vm1397_vm6, %v1676_v42, %v1680_v27  ;;  %v5000_v27 = vld [vmem:[#allocation32_spill] sm:$0xff] }
 0x28b   : > { %v1759_v61 = vadd.f32 %v4987_v49, %v1727_v50  ;;  %v1722_v5 = vmul.f32 %v4988_v16, %v1687_v9  ;;  %v1793_v26 = vmul.f32 %v3098_v2, %v1687_v9  ;;  %v1721_v1 = vmul.f32 %v4989_v48, %v1689_v43 }
 0x28c   : > { %v1731_v56 = vadd.f32 %v1723_v40, %v1642_v4  ;;  %v1792_v63 = vmul.f32 %v3097_v44, %v1689_v43  ;;  %v1604_v23 = vadd.f32 %v4990_v8, %v1572_v18  ;;  %v1605_v31 = vadd.f32 %v4991_v6, %v1573_v19  ;;  %v4995_v19 = vld [vmem:[#allocation21_spill] sm:$0xff]  ;;  %v5001_v4 = vld [vmem:[#allocation22_spill] sm:$0xff] }
 0x28d   : > { %v1799_v54 = vadd.f32 %v1791_v21, %v1759_v61  ;;  %v1730_v7 = vadd.f32 %v1722_v5, %v1641_v15  ;;  %v1688_v13 = vsel %vm1397_vm6, %v1682_v51, %v1686_v33  ;;  %v1729_v57 = vadd.f32 %v1721_v1, %v1640_v29  ;;  %v3642_v43 = vld [vmem:[#allocation8 + $0x200] ss:$16 sps:$4 sm:$0xff]   ;;  %v3650_v1 = vld [vmem:[#allocation8 + $0x224] ss:$16 sps:$4 sm:$0xff]   ;;  %v3653_v8 = vld [vmem:[#allocation8 + $0x22c] ss:$16 sps:$4 sm:$0xff]  }
 0x28e   : > { %v1763_v0 = vadd.f32 %v4992_v47, %v1731_v56  ;;  %v1800_v42 = vadd.f32 %v1792_v63, %v1760_v3  ;;  %v1644_v35 = vadd.f32 %v4993_v55, %v1604_v23  ;;  %v1645_v11 = vadd.f32 %v4727_v17, %v1605_v31  ;;  %v5002_v3 = vld [vmem:[#allocation35_spill] sm:$0xff]  ;;  %v3656_v6 = vld [vmem:[#allocation8 + $0x244] ss:$16 sps:$4 sm:$0xff]  }
 0x28f   : > { %v1762_v38 = vadd.f32 %v4994_v59, %v1730_v7  ;;  %v1690_v18 = vsel %vm1397_vm6, %v1678_v34, %v1682_v51  ;;  %v1726_v21 = vmul.f32 %v4988_v16, %v1688_v13  ;;  %v1761_v10 = vadd.f32 %v4995_v19, %v1729_v57  ;;  %v4998_v34 = vld [vmem:[#allocation28_spill] sm:$0xff]  ;;  %v3645_v16 = vld [vmem:[#allocation8 + $0x208] ss:$16 sps:$4 sm:$0xff]   ;;  %v3659_v31 = vld [vmem:[#allocation8 + $0x24c] ss:$16 sps:$4 sm:$0xff]  }
 0x290   : > { %v1803_v28 = vadd.f32 %v1795_v53, %v1763_v0  ;;  %v1725_v20 = vmul.f32 %v4989_v48, %v1690_v18  ;;  %v1764_v32 = vadd.f32 %v4996_v39, %v1732_v24  ;;  %v1798_v60 = vmul.f32 %v3099_v37, %v1774_v58  ;;  %v4999_v53 = vld [vmem:[#allocation33_spill] sm:$0xff]  ;;  %v3662_v0 = vld [vmem:[#allocation8 + $0x264] ss:$16 sps:$4 sm:$0xff]   ;;  %v3678_v39 = vld [vmem:[#allocation8 + $0x2c0] ss:$16 sps:$4 sm:$0xff]  }
 0x291   : > { %v1734_v14 = vadd.f32 %v1726_v21, %v1645_v11  ;;  %v1796_v46 = vmul.f32 %v3097_v44, %v1690_v18  ;;  %v1797_v33 = vmul.f32 %v3098_v2, %v1688_v13  ;;  %v1801_v52 = vadd.f32 %v1793_v26, %v1761_v10  ;;  %v3651_v7 = vld [vmem:[#allocation8 + $0x228] ss:$16 sps:$4 sm:$0xff]   ;;  %v3654_v13 = vld [vmem:[#allocation8 + $0x240] ss:$16 sps:$4 sm:$0xff]   ;;  %v3665_v57 = vld [vmem:[#allocation8 + $0x26c] ss:$16 sps:$4 sm:$0xff]  }
 0x292   : > { %v1733_v25 = vadd.f32 %v1725_v20, %v1644_v35  ;;  %v1829_v17 = vadd.f32 %v4997_v45, %v1799_v54  ;;  %v1833_v41 = vadd.f32 %v4997_v45, %v1803_v28  ;;  %v1830_v36 = vadd.f32 %v4999_v53, %v1800_v42  ;;  %v3648_v54 = vld [vmem:[#allocation8 + $0x220] ss:$16 sps:$4 sm:$0xff]   ;;  %v3657_v47 = vld [vmem:[#allocation8 + $0x248] ss:$16 sps:$4 sm:$0xff]   ;;  %v3668_v35 = vld [vmem:[#allocation8 + $0x284] ss:$16 sps:$4 sm:$0xff]  }
 0x293   : > { %v1766_v12 = vadd.f32 %v4998_v34, %v1734_v14  ;;  %v1804_v22 = vadd.f32 %v1796_v46, %v1764_v32  ;;  %v1802_v29 = vadd.f32 %v1794_v30, %v1762_v38  ;;  %v1831_v50 = vadd.f32 %v5000_v27, %v1801_v52  ;;  %v3660_v42 = vld [vmem:[#allocation8 + $0x260] ss:$16 sps:$4 sm:$0xff]   ;;  %v3663_v55 = vld [vmem:[#allocation8 + $0x268] ss:$16 sps:$4 sm:$0xff]   ;;  %v3671_v59 = vld [vmem:[#allocation8 + $0x28c] ss:$16 sps:$4 sm:$0xff]  }
 0x294   : > { %v1765_v24 = vadd.f32 %v5001_v4, %v1733_v25  ;;  %v1837_v37 = vmax.f32 %v1829_v17, 0.0  ;;  %v1841_v62 = vmax.f32 %v1833_v41, 0.0  ;;  %v1838_v9 = vmax.f32 %v1830_v36, 0.0  ;;  %v3666_v38 = vld [vmem:[#allocation8 + $0x280] ss:$16 sps:$4 sm:$0xff]  }
 0x295   : > { %v1834_v2 = vadd.f32 %v4999_v53, %v1804_v22  ;;  %v1806_v44 = vadd.f32 %v1798_v60, %v1766_v12  ;;  %v1832_v40 = vadd.f32 %v5002_v3, %v1802_v29  ;;  %v1839_v56 = vmax.f32 %v1831_v50, 0.0  ;;  %v3669_v11 = vld [vmem:[#allocation8 + $0x288] ss:$16 sps:$4 sm:$0xff]   ;;  %v3674_v18 = vld [vmem:[#allocation8 + $0x2a4] ss:$16 sps:$4 sm:$0xff]  }
 0x296   : > { %v1805_v58 = vadd.f32 %v1797_v33, %v1765_v24  ;;  %v1845_v15 = vpack.c.bf16 %v1841_v62, %v1837_v37  ;;  %v3677_v21 = vld [vmem:[#allocation8 + $0x2ac] ss:$16 sps:$4 sm:$0xff]   ;;  %v3672_v28 = vld [vmem:[#allocation8 + $0x2a0] ss:$16 sps:$4 sm:$0xff]   ;;  %v3675_v19 = vld [vmem:[#allocation8 + $0x2a8] ss:$16 sps:$4 sm:$0xff]  }
 0x297   : > { %v1842_v51 = vmax.f32 %v1834_v2, 0.0  ;;  %v1836_v49 = vadd.f32 %v5002_v3, %v1806_v44  ;;  %v1840_v5 = vmax.f32 %v1832_v40, 0.0  ;;  %v3680_v10 = vld [vmem:[#allocation8 + $0x2c4] ss:$16 sps:$4 sm:$0xff]   ;;  %v3683_v20 = vld [vmem:[#allocation8 + $0x2cc] ss:$16 sps:$4 sm:$0xff]  }
 0x298   : > { %v1835_v61 = vadd.f32 %v5000_v27, %v1805_v58  ;;  %v3681_v32 = vld [vmem:[#allocation8 + $0x2c8] ss:$16 sps:$4 sm:$0xff]   ;;  %v3686_v60 = vld [vmem:[#allocation8 + $0x2e4] ss:$16 sps:$4 sm:$0xff]   ;;  %v3689_v14 = vld [vmem:[#allocation8 + $0x2ec] ss:$16 sps:$4 sm:$0xff]  }
 0x299   : > { %v1846_v30 = vpack.c.bf16 %v1842_v51, %v1838_v9  ;;  %v1844_v26 = vmax.f32 %v1836_v49, 0.0  ;;  %v3684_v46 = vld [vmem:[#allocation8 + $0x2e0] ss:$16 sps:$4 sm:$0xff]   ;;  %v3687_v33 = vld [vmem:[#allocation8 + $0x2e8] ss:$16 sps:$4 sm:$0xff]  }
 0x29a   : > { %v1843_v48 = vmax.f32 %v1835_v61, 0.0  ;;  %v3692_v52 = vld [vmem:[#allocation8 + $0x304] ss:$16 sps:$4 sm:$0xff]   ;;  %v3695_v25 = vld [vmem:[#allocation8 + $0x30c] ss:$16 sps:$4 sm:$0xff]  }
 0x29b   : > { %2671 = vmatprep.mubr.bf16.mxu0 %v1846_v30  ;;  %2757 = vmatprep.mubr.bf16.mxu1 %v1846_v30  ;;  %v1848_v63 = vpack.c.bf16 %v1844_v26, %v1840_v5  ;;  %v3690_v45 = vld [vmem:[#allocation8 + $0x300] ss:$16 sps:$4 sm:$0xff]   ;;  %v3693_v17 = vld [vmem:[#allocation8 + $0x308] ss:$16 sps:$4 sm:$0xff]   ;;  %v3698_v41 = vld [vmem:[#allocation8 + $0x324] ss:$16 sps:$4 sm:$0xff]  }
 0x29c   : > { %2672 = vmatmul.mubr.bf16.vlgmr.msra.gmra.mrb[4].mxu0 %v1845_v15  ;;  %2758 = vmatmul.mubr.bf16.vlgmr.msra.gmra.mrb[4].mxu1 %v1845_v15  ;;  %v4834_v23 = vpack.c.bf16 %v1843_v48, %v1839_v56  ;;  %v3701_v34 = vld [vmem:[#allocation8 + $0x32c] ss:$16 sps:$4 sm:$0xff]   ;;  %v3696_v12 = vld [vmem:[#allocation8 + $0x320] ss:$16 sps:$4 sm:$0xff]   ;;  %v3699_v22 = vld [vmem:[#allocation8 + $0x328] ss:$16 sps:$4 sm:$0xff]  }
 0x29d   : > { %2683 = vmatpush1.bf16.msra.mxu0 %v3642_v43  ;;  %2769 = vmatpush1.bf16.msra.mxu1 %v3645_v16  ;;  %v3704_v53 = vld [vmem:[#allocation8 + $0x344] ss:$16 sps:$4 sm:$0xff]   ;;  %v3707_v36 = vld [vmem:[#allocation8 + $0x34c] ss:$16 sps:$4 sm:$0xff]   ;;  %v3702_v29 = vld [vmem:[#allocation8 + $0x340] ss:$16 sps:$4 sm:$0xff]  }
 0x29e   : > { %2684 = vmatprep.subr.bf16.mxu0 %v3650_v1  ;;  %2714 = vmatprep.mubr.bf16.mxu0 %v1848_v63  ;;  %v3705_v27 = vld [vmem:[#allocation8 + $0x348] ss:$16 sps:$4 sm:$0xff]   ;;  %v3710_v50 = vld [vmem:[#allocation8 + $0x364] ss:$16 sps:$4 sm:$0xff]   ;;  %v3713_v4 = vld [vmem:[#allocation8 + $0x36c] ss:$16 sps:$4 sm:$0xff]  }
 0x29f   : > { %2770 = vmatprep.subr.bf16.mxu1 %v3653_v8  ;;  %2800 = vmatprep.mubr.bf16.mxu1 %v1848_v63  ;;  %v3708_v24 = vld [vmem:[#allocation8 + $0x360] ss:$16 sps:$4 sm:$0xff]   ;;  %v3711_v37 = vld [vmem:[#allocation8 + $0x368] ss:$16 sps:$4 sm:$0xff]   ;;  %v3716_v62 = vld [vmem:[#allocation8 + $0x384] ss:$16 sps:$4 sm:$0xff]  }
 0x2a0   : > { %v3719_v2 = vld [vmem:[#allocation8 + $0x38c] ss:$16 sps:$4 sm:$0xff]   ;;  %v3714_v44 = vld [vmem:[#allocation8 + $0x380] ss:$16 sps:$4 sm:$0xff]   ;;  %v3717_v3 = vld [vmem:[#allocation8 + $0x388] ss:$16 sps:$4 sm:$0xff]  }
 0x2a1   : > { %2685 = vmatpush1.bf16.msra.mxu0 %v3648_v54  ;;  %2771 = vmatpush1.bf16.msra.mxu1 %v3651_v7  ;;  %v3722_v40 = vld [vmem:[#allocation8 + $0x3a4] ss:$16 sps:$4 sm:$0xff]   ;;  %v3725_v58 = vld [vmem:[#allocation8 + $0x3ac] ss:$16 sps:$4 sm:$0xff]   ;;  %v3720_v15 = vld [vmem:[#allocation8 + $0x3a0] ss:$16 sps:$4 sm:$0xff]  }
 0x2a2   : > { %2686 = vmatprep.subr.bf16.mxu0 %v3656_v6  ;;  %2772 = vmatprep.subr.bf16.mxu1 %v3659_v31  ;;  %v3723_v9 = vld [vmem:[#allocation8 + $0x3a8] ss:$16 sps:$4 sm:$0xff]   ;;  %v3728_v51 = vld [vmem:[#allocation8 + $0x3c4] ss:$16 sps:$4 sm:$0xff]   ;;  %v3731_v49 = vld [vmem:[#allocation8 + $0x3cc] ss:$16 sps:$4 sm:$0xff]  }
 0x2a3   : > { %v3726_v61 = vld [vmem:[#allocation8 + $0x3c0] ss:$16 sps:$4 sm:$0xff]   ;;  %v3729_v30 = vld [vmem:[#allocation8 + $0x3c8] ss:$16 sps:$4 sm:$0xff]   ;;  %v3734_v43 = vld [vmem:[#allocation8 + $0x3e4] ss:$16 sps:$4 sm:$0xff]  }
 0x2a4   : > { %v3737_v16 = vld [vmem:[#allocation8 + $0x3ec] ss:$16 sps:$4 sm:$0xff]   ;;  %v3732_v5 = vld [vmem:[#allocation8 + $0x3e0] ss:$16 sps:$4 sm:$0xff]   ;;  %v3735_v26 = vld [vmem:[#allocation8 + $0x3e8] ss:$16 sps:$4 sm:$0xff]  }
 0x2a5   : > { %2687 = vmatpush1.bf16.msra.mxu0 %v3654_v13  ;;  %2773 = vmatpush1.bf16.msra.mxu1 %v3657_v47  ;;  %v1977_v56 = vld [vmem:[%s4922_s6] sm:$0xf]  ;;  %v5004_v63 = vld [vmem:[#allocation17_spill] sm:$0xff]  ;;  %v5005_v54 = vld [vmem:[#allocation18_spill] sm:$0xff] }
 0x2a6   : > { %2688 = vmatprep.subr.bf16.mxu0 %v3662_v0  ;;  %2774 = vmatprep.subr.bf16.mxu1 %v3665_v57  ;;  %v5003_v48 = vld [vmem:[#allocation16_spill] sm:$0xff]  ;;  %v1990_v8 = vrot.slane %v1977_v56, %v5004_v63  ;;  %v1986_v7 = vrot.slane %v1977_v56, %v5005_v54  ;;  %v5006_v6 = vld [vmem:[#allocation19_spill] sm:$0xff] }
 0x2a7   : > { %v1982_v1 = vrot.slane %v1977_v56, %v5003_v48  ;;  %v1994_v31 = vrot.slane %v1977_v56, %v5006_v6 }
 0x2a9   : > { %2689 = vmatpush1.bf16.msra.mxu0 %v3660_v42  ;;  %2775 = vmatpush1.bf16.msra.mxu1 %v3663_v55 }
 0x2aa   : > { %2690 = vmatprep.subr.bf16.mxu0 %v3668_v35  ;;  %2776 = vmatprep.subr.bf16.mxu1 %v3671_v59 }
 0x2ad   : > { %2691 = vmatpush1.bf16.msra.mxu0 %v3666_v38  ;;  %2777 = vmatpush1.bf16.msra.mxu1 %v3669_v11  ;;  %v3738_v11 = vld [vmem:[%s4196_s1] sm:$0xff] }
 0x2ae   : > { %2692 = vmatprep.subr.bf16.mxu0 %v3674_v18  ;;  %2778 = vmatprep.subr.bf16.mxu1 %v3677_v21  ;;  %v3739_v21 = vld [vmem:[%s4196_s1 + $0x10] sm:$0xff] }
 0x2b1   : > { %2693 = vmatpush1.bf16.msra.mxu0 %v3672_v28  ;;  %2779 = vmatpush1.bf16.msra.mxu1 %v3675_v19 }
 0x2b2   : > { %2694 = vmatprep.subr.bf16.mxu0 %v3680_v10  ;;  %2780 = vmatprep.subr.bf16.mxu1 %v3683_v20 }
 0x2b5   : > { %2695 = vmatpush1.bf16.msra.mxu0 %v3678_v39  ;;  %2781 = vmatpush1.bf16.msra.mxu1 %v3681_v32  ;;  %v3740_v32 = vld [vmem:[%s4196_s1 + $0x8] sm:$0xff] }
 0x2b6   : > { %2696 = vmatprep.subr.bf16.mxu0 %v3686_v60  ;;  %2782 = vmatprep.subr.bf16.mxu1 %v3689_v14  ;;  %v3741_v14 = vld [vmem:[%s4196_s1 + $0x18] sm:$0xff] }
 0x2b9   : > { %2697 = vmatpush1.bf16.msra.mxu0 %v3684_v46  ;;  %2783 = vmatpush1.bf16.msra.mxu1 %v3687_v33 }
 0x2ba   : > { %2698 = vmatprep.subr.bf16.mxu0 %v3692_v52  ;;  %2784 = vmatprep.subr.bf16.mxu1 %v3695_v25 }
 0x2bd   : > { %2699 = vmatpush1.bf16.msra.mxu0 %v3690_v45  ;;  %2785 = vmatpush1.bf16.msra.mxu1 %v3693_v17  ;;  %v3742_v17 = vld [vmem:[%s4196_s1 + $0x20] sm:$0xff] }
 0x2be   : > { %2700 = vmatprep.subr.bf16.mxu0 %v3698_v41  ;;  %2786 = vmatprep.subr.bf16.mxu1 %v3701_v34  ;;  %v3743_v34 = vld [vmem:[%s4196_s1 + $0x30] sm:$0xff] }
 0x2c1   : > { %2701 = vmatpush1.bf16.msra.mxu0 %v3696_v12  ;;  %2787 = vmatpush1.bf16.msra.mxu1 %v3699_v22 }
 0x2c2   : > { %2702 = vmatprep.subr.bf16.mxu0 %v3704_v53  ;;  %2788 = vmatprep.subr.bf16.mxu1 %v3707_v36  ;;  %v3744_v36 = vld [vmem:[%s4196_s1 + $0x28] sm:$0xff] }
 0x2c5   : > { %2703 = vmatpush1.bf16.msra.mxu0 %v3702_v29  ;;  %2789 = vmatpush1.bf16.msra.mxu1 %v3705_v27  ;;  %v3745_v27 = vld [vmem:[%s4196_s1 + $0x38] sm:$0xff]  ;;  %s3945_s1 = smov [#allocation10]  }
 0x2c6   : > { %2704 = vmatprep.subr.bf16.mxu0 %v3710_v50  ;;  %2790 = vmatprep.subr.bf16.mxu1 %v3713_v4  ;;  %s3864_s30 = sshll.u32 %s3945_s1, 4  ;;  %s3865_s30 = int_to_ptr.vmem [resolvable:$false] %s3864_s30 }
 0x2c7   : > { %s3866_s9 = scalar_lea.vmem %s3865_s30, 2048  ;;  %p3867_p12 = scmp.lt.s32.totalorder %s4857_s18, %s3865_s30 }
 0x2c8   : > { %p3868_p1 = scmp.lt.s32.totalorder %s3866_s9, %s3860_s11 }
 0x2c9   : > { %2705 = vmatpush1.bf16.msra.mxu0 %v3708_v24  ;;  %2791 = vmatpush1.bf16.msra.mxu1 %v3711_v37 }
 0x2ca   : > { %2706 = vmatprep.subr.bf16.mxu0 %v3716_v62  ;;  %2792 = vmatprep.subr.bf16.mxu1 %v3719_v2  ;;  %p3869_p2 = por %p3868_p1, %p3867_p12 }
 0x2cc   : > { %p3870_p4 = pnand %p3869_p2, %p3863_p7 }
 0x2cd   : > { %2707 = vmatpush1.bf16.msra.mxu0 %v3714_v44  ;;  %2793 = vmatpush1.bf16.msra.mxu1 %v3717_v3 }
 0x2ce   : > { %2708 = vmatprep.subr.bf16.mxu0 %v3722_v40  ;;  %2794 = vmatprep.subr.bf16.mxu1 %v3725_v58 }
 0x2d1   : > { %2709 = vmatpush1.bf16.msra.mxu0 %v3720_v15  ;;  %2795 = vmatpush1.bf16.msra.mxu1 %v3723_v9 }
 0x2d2   : > { %2710 = vmatprep.subr.bf16.mxu0 %v3728_v51  ;;  %2796 = vmatprep.subr.bf16.mxu1 %v3731_v49 }
 0x2d5   : > { %2711 = vmatpush1.bf16.msra.mxu0 %v3726_v61  ;;  %2797 = vmatpush1.bf16.msra.mxu1 %v3729_v30 }
 0x2d6   : > { %2712 = vmatprep.subr.bf16.mxu0 %v3734_v43  ;;  %2798 = vmatprep.subr.bf16.mxu1 %v3737_v16 }
 0x2d9   : > { %2713 = vmatpush1.bf16.msra.mxu0 %v3732_v5  ;;  %2799 = vmatpush1.bf16.msra.mxu1 %v3735_v26 }
 0x2dc   : > { %2715 = vmatmul.mubr.bf16.vlgmr.msra.gmra.mrb[4].mxu0 %v4834_v23  ;;  %2801 = vmatmul.mubr.bf16.vlgmr.msra.gmra.mrb[4].mxu1 %v4834_v23 }
 0x3af   : > { %v2716_v13 = vpop.f32.mrb[4].mxu0  ;;  %v2802_v47 = vpop.f32.mrb[4].mxu1 }
 0x3b0   : > { %v3246_v0 = vadd.f32 %v2716_v13, %v1982_v1  ;;  %v3250_v57 = vadd.f32 %v2802_v47, %v1990_v8  ;;  %v2718_v23 = vpop.f32.mrb[5].mxu0  ;;  %v2804_v42 = vpop.f32.mrb[5].mxu1 }
 0x3b1   : > { %v3247_v55 = vadd.f32 %v2718_v23, %v1986_v7  ;;  %v3251_v35 = vadd.f32 %v2804_v42, %v1994_v31  ;;  %v2720_v59 = vpop.f32.mrb[6].mxu0  ;;  %v2806_v38 = vpop.f32.mrb[6].mxu1 }
 0x3b2   : > { %v2811_v18 = vadd.f32 %v3738_v11, %v3246_v0  ;;  %v2813_v28 = vadd.f32 %v3739_v21, %v3250_v57  ;;  %v3248_v19 = vadd.f32 %v2720_v59, %v1982_v1  ;;  %v3252_v10 = vadd.f32 %v2806_v38, %v1990_v8  ;;  %v2722_v20 = vpop.f32.mrb[7].mxu0  ;;  %v2808_v39 = vpop.f32.mrb[7].mxu1 }
 0x3b3   : > { %v2812_v60 = vadd.f32 %v3740_v32, %v3247_v55  ;;  %v2814_v46 = vadd.f32 %v3741_v14, %v3251_v35  ;;  %v3249_v33 = vadd.f32 %v2722_v20, %v1986_v7  ;;  %v3253_v52 = vadd.f32 %v2808_v39, %v1994_v31 }
 0x3b4   : > { %v2819_v25 = vmax.f32 %v2811_v18, 0.0  ;;  %v2821_v45 = vmax.f32 %v2813_v28, 0.0  ;;  %v2815_v41 = vadd.f32 %v3742_v17, %v3248_v19  ;;  %v2817_v12 = vadd.f32 %v3743_v34, %v3252_v10 }
 0x3b5   : > { %v2820_v22 = vmax.f32 %v2812_v60, 0.0  ;;  %v2822_v53 = vmax.f32 %v2814_v46, 0.0  ;;  %v2816_v29 = vadd.f32 %v3744_v36, %v3249_v33  ;;  %v2818_v50 = vadd.f32 %v3745_v27, %v3253_v52 }
 0x3b6   : > { %2827 = vst [vmem:[%s4848_s14] sm:$0xff] %v2819_v25  ;;  %2829 = vst [vmem:[%s4848_s14 + $0x10] sm:$0xff] %v2821_v45  ;;  %v2823_v4 = vmax.f32 %v2815_v41, 0.0  ;;  %v2825_v24 = vmax.f32 %v2817_v12, 0.0 }
 0x3b7   : > { %2828 = vst [vmem:[%s4848_s14 + $0x8] sm:$0xff] %v2820_v22  ;;  %2830 = vst [vmem:[%s4848_s14 + $0x18] sm:$0xff] %v2822_v53  ;;  %v2824_v37 = vmax.f32 %v2816_v29, 0.0  ;;  %v2826_v62 = vmax.f32 %v2818_v50, 0.0 }
 0x3b8   : > { %2831 = vst [vmem:[%s4848_s14 + $0x20] sm:$0xff] %v2823_v4  ;;  %2833 = vst [vmem:[%s4848_s14 + $0x30] sm:$0xff] %v2825_v24 }
 0x3b9   : > { %2832 = vst [vmem:[%s4848_s14 + $0x28] sm:$0xff] %v2824_v37  ;;  %2834 = vst [vmem:[%s4848_s14 + $0x38] sm:$0xff] %v2826_v62 }
 0x3ba   : > { %3873 = shalt.err (!%p3870_p4)
}
 0x3bb   : > { %s3874_s13 = scalar_lea.hbm %s4866_s22, 1024  ;;  %s3878_s10 = scalar_lea.hbm %s4923_s7, 2048 }
 0x3bc   : > { %p3875_p9 = scmp.ne.s32.totalorder %s4866_s22, %s3874_s13  ;;  %p3879_p8 = scmp.lt.u32.totalorder %s4866_s22, %s4923_s7 }
 0x3bd   : > { %p3880_p13 = scmp.lt.u32.totalorder %s3878_s10, %s3874_s13  ;;  %p3882_p10 = scmp.lt.u32.totalorder %s3874_s13, %s4866_s22 }
 0x3be   : > { %p3876_p0 = pnand %p3875_p9, %p4139_p5 }
 0x3bf   : > { %p3881_p6 = por %p3880_p13, %p3879_p8 }
 0x3c0   : > { %p3877_p11 = pneg %p3876_p0 }
 0x3c1   : > { %p3883_p3 = por %p3882_p10, %p3881_p6 }
 0x3c3   : > { %p3884_p7 = pnand %p3883_p3, %p3877_p11 }
 0x3c5   : > { %3887 = shalt.err (!%p3884_p7)
}
 0x3c6   : > { %s3946_s29 = smov 512   ;;  %s3947_s28 = smov 32  }
 0x3c7   : > { %3284 = dma.vmem_to_hbm [thread:$0]  (%p4139_p5), %s4857_s18, 1024, %s4866_s22, %s2836_s23, %s3946_s29, %s3946_s29, %s3947_s28  }
 0x3c8 PF: > { %s5007_s12 = sld [smem:[#allocation15_spill]]  ;;  %s2865_s11 = sand.u32 1, %s3922_s24  }
 0x3c9   : > { %p5009_p1 = scmp.ge.s32.totalorder %s3934_s27, 2  ;;  %s2866_s1 = scalar_lea.sflag [#allocation4], %s2865_s11 }
 0x3ce   : > { %p5008_p12 = scmp.ne.s32.totalorder %s5007_s12, 0 }
 0x3d0   : > { %p3301_p2 = pnand %p5009_p1, %p5008_p12 }
 0x3d2   : > { %3917 = dma.done.wait (!%p3301_p2), %s2866_s1, 1024  }
 0x3d3   : > { %3919 = vsyncadd (!%p3301_p2), %s2866_s1, 4294966272  ;;  %p22_p4 = scmp.ge.s32.totalorder %s4104_s21, 4   ;;  %s5010_s24 = smov %s3926_s25 }
 0x3d4   : > { %s5011_s25 = smov %s3930_s26  ;;  %s5012_s26 = smov %s4135_s16 }
 0x3d5   : > { %s5013_s27 = smov %s4104_s21  ;;  %24 = sbr.rel (!%p22_p4) target bundleno = 9 (0x9), region = 105 }
 0x3dc   :  { %2871 = vsyncpa [#allocation3], 1 }
 0x3dd   :  { %2873 = vsyncpa [#allocation3 + $0x1], 1 }
 0x3de   :  { %2874 = vsyncpa [#allocation6], 1 }
 0x3df   :  { %2875 = vsyncpa [#allocation9], 1 }
 0x3e0   :  { %2876 = vsyncpa [#allocation4], 1 }
 0x3e1   :  { %2878 = vsyncpa [#allocation4 + $0x1], 1 }

</bundles_post_ra>
